<compile_context>
chip_gen: v5e
topology: v5e:2x2
jax: 0.10.0
libtpu: 0.0.40
codegen_flags: <defaults>
</compile_context>

<pallas_src>
import numpy as np
import jax
import jax.numpy as jnp
from jax import lax
from jax.experimental import pallas as pl
from jax.experimental.pallas import tpu as pltpu


# ----------------------------------------------------------------------------
# Deterministic "parameters": separable 1-D Gaussian filters.
# GaussianSmoothing(5, sigma=8) and the SSIM window outer(g, g) are both
# separable products of a normalized 1-D Gaussian.
# ----------------------------------------------------------------------------
def _gaussian_1d(size, sigma):
    x = np.arange(size, dtype=np.float64)
    mean = (size - 1) / 2.0
    g = np.exp(-(((x - mean) / sigma) ** 2) / 2.0)
    return (g / g.sum()).astype(np.float32)


GAUSS_G1D = _gaussian_1d(5, 8.0)    # GaussianSmoothing kernel (5x5, sigma 8)
SSIM_G1D = _gaussian_1d(7, 1.5)     # SSIM window (7x7, sigma 1.5)
FLOW_NORM_FACTOR = (80.0, 80.0)
DIM_WEIGHTS = (0.5, 0.5)            # already normalized (sum == 1)
VMEM_LIMIT = 32 * 1024 * 1024       # safe on v5e/v6e/v7x (== v6e/v7x default)
# bf16 warp matmul is ~3x MXU throughput on v6e/v7x but loses ~3 decimal
# digits on the bilinear weights (flagged in review); keep f32 by default.
WARP_MATMUL_BF16 = False


# ----------------------------------------------------------------------------
# Block-size heuristics (all static, evaluated at trace time)
# ----------------------------------------------------------------------------
def _pick_batch_block(num_images, bytes_per_image, target_bytes=2 << 20):
    """Images per grid step: amortize per-step overhead but keep >=2 grid
    points (v7x megacore) and bounded block bytes."""
    bc = 1
    for cand in range(1, num_images + 1):
        if num_images % cand:
            continue
        if cand * bytes_per_image > target_bytes:
            break
        if cand > 1 and num_images // cand < 2:
            break
        bc = cand
    return bc


def _pick_row_tile(H, D, W, budget_bytes=2 << 20):
    """Row tile for the masked-L1 reduction: multiple of 8 (or full H)."""
    max_rows = max(8, budget_bytes // max(1, D * W * 4))
    if H <= max_rows:
        return H
    best = None
    for th in range(8, min(H, max_rows) + 1, 8):
        if H % th == 0:
            best = th
    return best if best is not None else H


def _pick_query_block(H, W, budget_bytes=6 << 20):
    """Lane-axis query-chunk size for the warp kernel: multiple of 128 that
    divides H*W (or the full H*W) keeping (W+2H)*Q*4B intermediates bounded."""
    HW = H * W
    per_q = (W + 2 * H + 2) * 4
    if HW * per_q <= budget_bytes:
        return HW
    max_q = max(128, budget_bytes // per_q)
    best, q = None, 128
    while q <= min(HW, max_q):
        if HW % q == 0:
            best = q
        q += 128
    return best if best is not None else HW


# ----------------------------------------------------------------------------
# Pallas kernels
# ----------------------------------------------------------------------------
def _make_masked_l1_kernel(D):
    """Per-(batch, row-tile) partial sums of |pred-tgt|*mask per dim + mask
    count, packed into lanes 0..D of an (8,128) tile."""
    def kernel(pred_ref, tflow_ref, mask_ref, o_ref):
        m = (mask_ref[0] > 0.0).astype(jnp.float32)          # (th, W)
        lane = lax.broadcasted_iota(jnp.int32, (8, 128), 1)

        def total(x):                                        # (th, W) -> (1,1)
            return jnp.sum(jnp.sum(x, axis=-1, keepdims=True),
                           axis=-2, keepdims=True)

        tile = jnp.where(lane == D, total(m), 0.0)           # count in lane D
        for d in range(D):
            s = total(jnp.abs(pred_ref[0, d] - tflow_ref[0, d]) * m)
            tile = tile + jnp.where(lane == d, s, 0.0)
        o_ref[0, 0] = tile

    return kernel


def _make_sep_conv_kernel(g1d, H, W):
    """Separable depthwise 'same' conv (zero padded input supplied)."""
    taps = [float(t) for t in g1d]
    K = len(taps)

    def kernel(x_ref, o_ref):
        x = x_ref[...]                                       # (Bc, H+K-1, W+K-1)
        v = taps[0] * x[:, 0:H, :]                           # vertical pass
        for k in range(1, K):
            v = v + taps[k] * x[:, k:k + H, :]
        o = taps[0] * v[:, :, 0:W]                           # horizontal pass
        for k in range(1, K):
            o = o + taps[k] * v[:, :, k:k + W]
        o_ref[...] = o

    return kernel


def _make_upsmooth_absdiff_kernel(g1d, H, W):
    """Fused: separable Gaussian on the upsampled flow + sum(|pred - sm|)."""
    taps = [float(t) for t in g1d]
    K = len(taps)

    def kernel(up_ref, pred_ref, o_ref):
        x = up_ref[...]                                      # (Bc, H+K-1, W+K-1)
        v = taps[0] * x[:, 0:H, :]
        for k in range(1, K):
            v = v + taps[k] * x[:, k:k + H, :]
        sm = taps[0] * v[:, :, 0:W]
        for k in range(1, K):
            sm = sm + taps[k] * v[:, :, k:k + W]
        d = jnp.abs(pred_ref[...] - sm)                      # (Bc, H, W)
        s = jnp.sum(jnp.sum(jnp.sum(d, axis=-1, keepdims=True),
                            axis=-2, keepdims=True), axis=0, keepdims=True)
        o_ref[0] = jnp.broadcast_to(s[0], (8, 128))

    return kernel


def _make_ssim_sum_kernel(g1d, H, W):
    """SSIM with separable 7x7 window; emits the per-block SSIM-map sum."""
    taps = [float(t) for t in g1d]
    K = len(taps)
    C1, C2 = 0.01 ** 2, 0.03 ** 2

    def sep(m):                                              # (Bc,Hp,Wp)->(Bc,H,W)
        v = taps[0] * m[:, 0:H, :]
        for k in range(1, K):
            v = v + taps[k] * m[:, k:k + H, :]
        o = taps[0] * v[:, :, 0:W]
        for k in range(1, K):
            o = o + taps[k] * v[:, :, k:k + W]
        return o

    def kernel(a_ref, b_ref, o_ref):
        a = a_ref[...]
        b = b_ref[...]
        mu1 = sep(a)
        mu2 = sep(b)
        e11 = sep(a * a)
        e22 = sep(b * b)
        e12 = sep(a * b)
        mu1_sq = mu1 * mu1
        mu2_sq = mu2 * mu2
        mu1_mu2 = mu1 * mu2
        sigma1_sq = e11 - mu1_sq
        sigma2_sq = e22 - mu2_sq
        sigma12 = e12 - mu1_mu2
        num = (2.0 * mu1_mu2 + C1) * (2.0 * sigma12 + C2)
        den = (mu1_sq + mu2_sq + C1) * (sigma1_sq + sigma2_sq + C2)
        ssim_map = num / den                                 # (Bc, H, W)
        s = jnp.sum(jnp.sum(jnp.sum(ssim_map, axis=-1, keepdims=True),
                            axis=-2, keepdims=True), axis=0, keepdims=True)
        o_ref[0] = jnp.broadcast_to(s[0], (8, 128))

    return kernel


def _make_warp_kernel(H, W, use_bf16):
    """Bilinear grid_sample (zeros padding, align_corners=True) reformulated
    as tent-weight matmul; queries live on the lane axis (lane-dense I/O)."""
    def kernel(xs_ref, ys_ref, img_ref, o_ref):
        xs = xs_ref[0]                                       # (1, Q) pixel x
        ys = ys_ref[0]                                       # (1, Q) pixel y
        img = img_ref[0]                                     # (H, W)
        ix = lax.broadcasted_iota(jnp.int32, (W, xs.shape[1]), 0).astype(jnp.float32)
        iy = lax.broadcasted_iota(jnp.int32, (H, ys.shape[1]), 0).astype(jnp.float32)
        # tent weights == bilinear weights with zeros padding for OOB samples
        ax_t = jnp.maximum(0.0, 1.0 - jnp.abs(xs - ix))      # (W, Q)
        ay_t = jnp.maximum(0.0, 1.0 - jnp.abs(ys - iy))      # (H, Q)
        if use_bf16:
            tmp = jnp.dot(img.astype(jnp.bfloat16), ax_t.astype(jnp.bfloat16),
                          preferred_element_type=jnp.float32)
        else:
            tmp = jnp.dot(img, ax_t, preferred_element_type=jnp.float32)  # (H, Q)
        o_ref[0] = jnp.sum(ay_t * tmp, axis=0, keepdims=True)             # (1, Q)

    return kernel


# ----------------------------------------------------------------------------
# Pallas wrappers
# ----------------------------------------------------------------------------
def _masked_l1_stats(pred, tflow, mask):
    """Returns (per-dim masked-|diff| sums (D,), mask count scalar)."""
    N, D, H, W = pred.shape
    th = _pick_row_tile(H, D, W)
    R = H // th
    partial = pl.pallas_call(
        _make_masked_l1_kernel(D),
        grid=(N, R),
        in_specs=[
            pl.BlockSpec((1, D, th, W), lambda b, r: (b, 0, r, 0)),
            pl.BlockSpec((1, D, th, W), lambda b, r: (b, 0, r, 0)),
            pl.BlockSpec((1, th, W), lambda b, r: (b, r, 0)),
        ],
        out_specs=pl.BlockSpec((1, 1, 8, 128), lambda b, r: (b, r, 0, 0)),
        out_shape=jax.ShapeDtypeStruct((N, R, 8, 128), jnp.float32),
        compiler_params=pltpu.CompilerParams(
            dimension_semantics=("parallel", "parallel"),
            vmem_limit_bytes=VMEM_LIMIT),
    )(pred, tflow, mask)
    vals = partial[:, :, 0, :]                               # (N, R, 128)
    sums = jnp.sum(vals[:, :, :D], axis=(0, 1))              # (D,)
    cnt = jnp.sum(vals[:, :, D])
    return sums, cnt


def _gauss_smooth_stride1(x, g1d):
    """Depthwise stride-1 'same' Gaussian smoothing (separable)."""
    N, C, H, W = x.shape
    K = len(g1d)
    p = K // 2
    M = N * C
    xp = jnp.pad(x.reshape(M, H, W), ((0, 0), (p, p), (p, p)))
    Bc = _pick_batch_block(M, (H + 2 * p) * (W + 2 * p) * 4)
    out = pl.pallas_call(
        _make_sep_conv_kernel(g1d, H, W),
        grid=(M // Bc,),
        in_specs=[pl.BlockSpec((Bc, H + 2 * p, W + 2 * p), lambda b: (b, 0, 0))],
        out_specs=pl.BlockSpec((Bc, H, W), lambda b: (b, 0, 0)),
        out_shape=jax.ShapeDtypeStruct((M, H, W), jnp.float32),
        compiler_params=pltpu.CompilerParams(
            dimension_semantics=("parallel",),
            vmem_limit_bytes=VMEM_LIMIT),
    )(xp)
    return out.reshape(N, C, H, W)


def _smooth_loss(pred, g1d):
    """mean(|pred - upsmooth(nearest_up(downsample(pred)))|)."""
    N, D, H, W = pred.shape
    K = len(g1d)
    p = K // 2
    # GaussianSmoothing(stride=2) == stride-1 smoothing subsampled by 2.
    down = _gauss_smooth_stride1(pred, g1d)[:, :, ::2, ::2]
    Hd, Wd = down.shape[2], down.shape[3]
    # nearest-neighbor upsample back to (H, W) (matches floor(i*Hd/H) rounding)
    if H == 2 * Hd and W == 2 * Wd:
        up = jnp.repeat(jnp.repeat(down, 2, axis=2), 2, axis=3)
    else:
        iy = (jnp.arange(H) * Hd) // H
        ix = (jnp.arange(W) * Wd) // W
        up = jnp.take(jnp.take(down, iy, axis=2), ix, axis=3)
    # fused upsmooth conv + |pred - smoothed| partial-sum reduction
    M = N * D
    upp = jnp.pad(up.reshape(M, H, W), ((0, 0), (p, p), (p, p)))
    pr = pred.reshape(M, H, W)
    bytes_per = ((H + 2 * p) * (W + 2 * p) + H * W) * 4
    Bc = _pick_batch_block(M, bytes_per)
    G = M // Bc
    partial = pl.pallas_call(
        _make_upsmooth_absdiff_kernel(g1d, H, W),
        grid=(G,),
        in_specs=[
            pl.BlockSpec((Bc, H + 2 * p, W + 2 * p), lambda b: (b, 0, 0)),
            pl.BlockSpec((Bc, H, W), lambda b: (b, 0, 0)),
        ],
        out_specs=pl.BlockSpec((1, 8, 128), lambda b: (b, 0, 0)),
        out_shape=jax.ShapeDtypeStruct((G, 8, 128), jnp.float32),
        compiler_params=pltpu.CompilerParams(
            dimension_semantics=("parallel",),
            vmem_limit_bytes=VMEM_LIMIT),
    )(upp, pr)
    return jnp.sum(partial[:, 0, 0]) / (M * H * W)


def _ssim_mean(img1, img2, g1d):
    """Mean SSIM (window 7, sigma 1.5), mean fused into the kernel."""
    N, _, H, W = img1.shape
    K = len(g1d)
    p = K // 2
    ap = jnp.pad(img1[:, 0], ((0, 0), (p, p), (p, p)))
    bp = jnp.pad(img2[:, 0], ((0, 0), (p, p), (p, p)))
    Bc = _pick_batch_block(N, 2 * (H + 2 * p) * (W + 2 * p) * 4,
                           target_bytes=1 << 20)
    G = N // Bc
    partial = pl.pallas_call(
        _make_ssim_sum_kernel(g1d, H, W),
        grid=(G,),
        in_specs=[
            pl.BlockSpec((Bc, H + 2 * p, W + 2 * p), lambda b: (b, 0, 0)),
            pl.BlockSpec((Bc, H + 2 * p, W + 2 * p), lambda b: (b, 0, 0)),
        ],
        out_specs=pl.BlockSpec((1, 8, 128), lambda b: (b, 0, 0)),
        out_shape=jax.ShapeDtypeStruct((G, 8, 128), jnp.float32),
        compiler_params=pltpu.CompilerParams(
            dimension_semantics=("parallel",),
            vmem_limit_bytes=VMEM_LIMIT),
    )(ap, bp)
    return jnp.sum(partial[:, 0, 0]) / (N * H * W)


def _grid_sample_bilinear(img, xs_pix, ys_pix):
    """img: (N,1,H,W); xs_pix/ys_pix: (N,H,W) sample coords in pixels.
    Matches torch.grid_sample(mode='bilinear', padding_mode='zeros',
    align_corners=True)."""
    N, _, H, W = img.shape
    HW = H * W
    Q = _pick_query_block(H, W)
    R = HW // Q
    xs = xs_pix.reshape(N, 1, HW)
    ys = ys_pix.reshape(N, 1, HW)
    im = img[:, 0]                                           # (N, H, W)
    out = pl.pallas_call(
        _make_warp_kernel(H, W, WARP_MATMUL_BF16),
        grid=(N, R),
        in_specs=[
            pl.BlockSpec((1, 1, Q), lambda b, r: (b, 0, r)),
            pl.BlockSpec((1, 1, Q), lambda b, r: (b, 0, r)),
            pl.BlockSpec((1, H, W), lambda b, r: (b, 0, 0)),
        ],
        out_specs=pl.BlockSpec((1, 1, Q), lambda b, r: (b, 0, r)),
        out_shape=jax.ShapeDtypeStruct((N, 1, HW), jnp.float32),
        compiler_params=pltpu.CompilerParams(
            dimension_semantics=("parallel", "parallel"),
            vmem_limit_bytes=VMEM_LIMIT),
    )(xs, ys, im)
    return out.reshape(N, 1, H, W)


# ----------------------------------------------------------------------------
# FlowLoss forward
# ----------------------------------------------------------------------------
@jax.jit
def flow_loss_forward(prediction, target):
    """prediction: (N, 2, H, W)  -- (flow_x, flow_y), normalized to [-1, 1]
       target:     (N, 5, H, W)  -- (flow_x, flow_y, mask, input_t0, input_t1)"""
    prediction = prediction.astype(jnp.float32)
    target = target.astype(jnp.float32)
    N, n_dims, H, W = prediction.shape

    # --- instance loss: per-dim masked L1 mean -------------------------------
    sums, cnt = _masked_l1_stats(prediction, target[:, :n_dims], target[:, -3])
    # TODO(synk): like PyTorch, an all-zero mask yields NaN (no divide guard).
    instance_loss = sum((sums[d] / cnt) * DIM_WEIGHTS[d] for d in range(n_dims))

    # --- SSIM loss: warp t1 by (grid - flow), compare against t0 -------------
    flow_x = prediction[:, 0] * (FLOW_NORM_FACTOR[0] / (W / 2.0))
    flow_y = prediction[:, 1] * (FLOW_NORM_FACTOR[1] / (H / 2.0))
    grid_x = jnp.linspace(-1.0, 1.0, W)[None, None, :]
    grid_y = jnp.linspace(-1.0, 1.0, H)[None, :, None]
    samp_x = grid_x - flow_x                                 # (N, H, W)
    samp_y = grid_y - flow_y
    xs_pix = (samp_x + 1.0) * 0.5 * (W - 1)                  # align_corners=True
    ys_pix = (samp_y + 1.0) * 0.5 * (H - 1)
    warp = _grid_sample_bilinear(target[:, -1:], xs_pix, ys_pix)   # (N,1,H,W)
    ssim_loss = 1.0 - _ssim_mean(target[:, -2:-1], warp, SSIM_G1D)

    # --- smoothness loss ------------------------------------------------------
    smooth_loss = _smooth_loss(prediction, GAUSS_G1D)

    lw = [1.0, 0.01, 0.01]
    lw = [w / sum(lw) for w in lw]
    return instance_loss * lw[0] + ssim_loss * lw[1] + smooth_loss * lw[2]


if __name__ == "__main__":
    key = jax.random.PRNGKey(0)
    k1, k2, k3, k4, k5 = jax.random.split(key, 5)
    N, H, W = 2, 16, 16
    prediction = 0.1 * jax.random.normal(k1, (N, 2, H, W), jnp.float32)
    tgt_flow = 0.1 * jax.random.normal(k2, (N, 2, H, W), jnp.float32)
    mask = (jax.random.uniform(k3, (N, 1, H, W)) > 0.4).astype(jnp.float32)
    t0 = jax.random.uniform(k4, (N, 1, H, W), dtype=jnp.float32)
    t1 = jax.random.uniform(k5, (N, 1, H, W), dtype=jnp.float32)
    # target channel order: (flow_x, flow_y, mask, input_t0, input_t1)
    target = jnp.concatenate([tgt_flow, mask, t0, t1], axis=1)   # (N, 5, H, W)

    loss = flow_loss_forward(prediction, target)
    jax.block_until_ready(loss)
    assert bool(jnp.isfinite(loss)), loss
    print("KERNEL_OK")
</pallas_src>

<mosaic_0001>
module attributes {stable_mosaic.version = 11 : i64} {
  func.func @kernel(%arg0: i32, %arg1: i32, %arg2: memref<1x2x16x16xf32, #tpu.memory_space<vmem>>, %arg3: memref<1x2x16x16xf32, #tpu.memory_space<vmem>>, %arg4: memref<1x16x16xf32, #tpu.memory_space<vmem>>, %arg5: memref<1x1x8x128xf32, #tpu.memory_space<vmem>>) attributes {dimension_semantics = [#tpu.dimension_semantics<parallel>, #tpu.dimension_semantics<parallel>], iteration_bounds = array<i64: 2, 1>, scalar_prefetch = 0 : i64, scratch_operands = 0 : i64, tpu.core_type = #tpu.core_type<tc>, window_params = [{transform_indices = @transform_0, window_bounds = array<i64: 1, 2, 16, 16>}, {transform_indices = @transform_1, window_bounds = array<i64: 1, 2, 16, 16>}, {transform_indices = @transform_2, window_bounds = array<i64: 1, 16, 16>}, {transform_indices = @transform_3, window_bounds = array<i64: 1, 1, 8, 128>}]} {
    %c0 = arith.constant 0 : index
    %c0_0 = arith.constant 0 : index
    %c0_1 = arith.constant 0 : index
    %0 = vector.load %arg4[%c0, %c0_0, %c0_1] : memref<1x16x16xf32, #tpu.memory_space<vmem>>, vector<1x16x16xf32>
    %1 = vector.shape_cast %0 : vector<1x16x16xf32> to vector<16x16xf32>
    %cst = arith.constant 0.000000e+00 : f32
    %2 = vector.broadcast %cst : f32 to vector<16x16xf32>
    %3 = arith.cmpf ogt, %1, %2 : vector<16x16xf32>
    %4 = arith.extui %3 : vector<16x16xi1> to vector<16x16xi32>
    %5 = arith.sitofp %4 : vector<16x16xi32> to vector<16x16xf32>
    %6 = tpu.iota {dimensions = array<i32: 1>} : vector<8x128xi32>
    %c2_i32 = arith.constant 2 : i32
    %7 = vector.broadcast %c2_i32 : i32 to vector<8x128xi32>
    %8 = arith.cmpi eq, %6, %7 : vector<8x128xi32>
    %cst_2 = arith.constant dense<0.000000e+00> : vector<16xf32>
    %9 = vector.multi_reduction <add>, %5, %cst_2 [1] : vector<16x16xf32> to vector<16xf32>
    %10 = vector.shape_cast %9 : vector<16xf32> to vector<16x1xf32>
    %cst_3 = arith.constant dense<0.000000e+00> : vector<1xf32>
    %11 = vector.multi_reduction <add>, %10, %cst_3 [0] : vector<16x1xf32> to vector<1xf32>
    %12 = vector.shape_cast %11 : vector<1xf32> to vector<1x1xf32>
    %cst_4 = arith.constant 0.000000e+00 : f32
    %13 = vector.shape_cast %12 : vector<1x1xf32> to vector<1x1xf32>
    %14 = vector.broadcast %13 : vector<1x1xf32> to vector<8x128xf32>
    %15 = vector.broadcast %cst_4 : f32 to vector<8x128xf32>
    %16 = arith.select %8, %14, %15 : vector<8x128xi1>, vector<8x128xf32>
    %c0_5 = arith.constant 0 : index
    %c0_6 = arith.constant 0 : index
    %c0_7 = arith.constant 0 : index
    %c0_8 = arith.constant 0 : index
    %17 = vector.load %arg2[%c0_5, %c0_6, %c0_7, %c0_8] : memref<1x2x16x16xf32, #tpu.memory_space<vmem>>, vector<1x1x16x16xf32>
    %18 = vector.shape_cast %17 : vector<1x1x16x16xf32> to vector<16x16xf32>
    %c0_9 = arith.constant 0 : index
    %c0_10 = arith.constant 0 : index
    %c0_11 = arith.constant 0 : index
    %c0_12 = arith.constant 0 : index
    %19 = vector.load %arg3[%c0_9, %c0_10, %c0_11, %c0_12] : memref<1x2x16x16xf32, #tpu.memory_space<vmem>>, vector<1x1x16x16xf32>
    %20 = vector.shape_cast %19 : vector<1x1x16x16xf32> to vector<16x16xf32>
    %21 = arith.subf %18, %20 : vector<16x16xf32>
    %22 = math.absf %21 : vector<16x16xf32>
    %23 = arith.mulf %22, %5 : vector<16x16xf32>
    %cst_13 = arith.constant dense<0.000000e+00> : vector<16xf32>
    %24 = vector.multi_reduction <add>, %23, %cst_13 [1] : vector<16x16xf32> to vector<16xf32>
    %25 = vector.shape_cast %24 : vector<16xf32> to vector<16x1xf32>
    %cst_14 = arith.constant dense<0.000000e+00> : vector<1xf32>
    %26 = vector.multi_reduction <add>, %25, %cst_14 [0] : vector<16x1xf32> to vector<1xf32>
    %27 = vector.shape_cast %26 : vector<1xf32> to vector<1x1xf32>
    %c0_i32 = arith.constant 0 : i32
    %28 = vector.broadcast %c0_i32 : i32 to vector<8x128xi32>
    %29 = arith.cmpi eq, %6, %28 : vector<8x128xi32>
    %cst_15 = arith.constant 0.000000e+00 : f32
    %30 = vector.shape_cast %27 : vector<1x1xf32> to vector<1x1xf32>
    %31 = vector.broadcast %30 : vector<1x1xf32> to vector<8x128xf32>
    %32 = vector.broadcast %cst_15 : f32 to vector<8x128xf32>
    %33 = arith.select %29, %31, %32 : vector<8x128xi1>, vector<8x128xf32>
    %34 = arith.addf %16, %33 : vector<8x128xf32>
    %c0_16 = arith.constant 0 : index
    %c1 = arith.constant 1 : index
    %c0_17 = arith.constant 0 : index
    %c0_18 = arith.constant 0 : index
    %35 = vector.load %arg2[%c0_16, %c1, %c0_17, %c0_18] : memref<1x2x16x16xf32, #tpu.memory_space<vmem>>, vector<1x1x16x16xf32>
    %36 = vector.shape_cast %35 : vector<1x1x16x16xf32> to vector<16x16xf32>
    %c0_19 = arith.constant 0 : index
    %c1_20 = arith.constant 1 : index
    %c0_21 = arith.constant 0 : index
    %c0_22 = arith.constant 0 : index
    %37 = vector.load %arg3[%c0_19, %c1_20, %c0_21, %c0_22] : memref<1x2x16x16xf32, #tpu.memory_space<vmem>>, vector<1x1x16x16xf32>
    %38 = vector.shape_cast %37 : vector<1x1x16x16xf32> to vector<16x16xf32>
    %39 = arith.subf %36, %38 : vector<16x16xf32>
    %40 = math.absf %39 : vector<16x16xf32>
    %41 = arith.mulf %40, %5 : vector<16x16xf32>
    %cst_23 = arith.constant dense<0.000000e+00> : vector<16xf32>
    %42 = vector.multi_reduction <add>, %41, %cst_23 [1] : vector<16x16xf32> to vector<16xf32>
    %43 = vector.shape_cast %42 : vector<16xf32> to vector<16x1xf32>
    %cst_24 = arith.constant dense<0.000000e+00> : vector<1xf32>
    %44 = vector.multi_reduction <add>, %43, %cst_24 [0] : vector<16x1xf32> to vector<1xf32>
    %45 = vector.shape_cast %44 : vector<1xf32> to vector<1x1xf32>
    %c1_i32 = arith.constant 1 : i32
    %46 = vector.broadcast %c1_i32 : i32 to vector<8x128xi32>
    %47 = arith.cmpi eq, %6, %46 : vector<8x128xi32>
    %cst_25 = arith.constant 0.000000e+00 : f32
    %48 = vector.shape_cast %45 : vector<1x1xf32> to vector<1x1xf32>
    %49 = vector.broadcast %48 : vector<1x1xf32> to vector<8x128xf32>
    %50 = vector.broadcast %cst_25 : f32 to vector<8x128xf32>
    %51 = arith.select %47, %49, %50 : vector<8x128xi1>, vector<8x128xf32>
    %52 = arith.addf %34, %51 : vector<8x128xf32>
    %c0_26 = arith.constant 0 : index
    %c0_27 = arith.constant 0 : index
    %c0_28 = arith.constant 0 : index
    %c0_29 = arith.constant 0 : index
    %53 = vector.load %arg5[%c0_26, %c0_27, %c0_28, %c0_29] : memref<1x1x8x128xf32, #tpu.memory_space<vmem>>, vector<1x1x8x128xf32>
    %54 = vector.shape_cast %53 : vector<1x1x8x128xf32> to vector<8x128xf32>
    %55 = vector.shape_cast %52 : vector<8x128xf32> to vector<1x1x8x128xf32>
    tpu.vector_store %arg5[%c0_26, %c0_27, %c0_28, %c0_29], %55 {strides = array<i32>} : memref<1x1x8x128xf32, #tpu.memory_space<vmem>>, vector<1x1x8x128xf32>,
    return
  }
  func.func @transform_0(%arg0: i32, %arg1: i32) -> (i32, i32, i32, i32) {
    %c0_i32 = arith.constant 0 : i32
    %c0_i32_0 = arith.constant 0 : i32
    %c0_i32_1 = arith.constant 0 : i32
    return %arg0, %c0_i32, %arg1, %c0_i32_0 : i32, i32, i32, i32
  }
  func.func @transform_1(%arg0: i32, %arg1: i32) -> (i32, i32, i32, i32) {
    %c0_i32 = arith.constant 0 : i32
    %c0_i32_0 = arith.constant 0 : i32
    %c0_i32_1 = arith.constant 0 : i32
    return %arg0, %c0_i32, %arg1, %c0_i32_0 : i32, i32, i32, i32
  }
  func.func @transform_2(%arg0: i32, %arg1: i32) -> (i32, i32, i32) {
    %c0_i32 = arith.constant 0 : i32
    %c0_i32_0 = arith.constant 0 : i32
    return %arg0, %arg1, %c0_i32 : i32, i32, i32
  }
  func.func @transform_3(%arg0: i32, %arg1: i32) -> (i32, i32, i32, i32) {
    %c0_i32 = arith.constant 0 : i32
    %c0_i32_0 = arith.constant 0 : i32
    %c0_i32_1 = arith.constant 0 : i32
    return %arg0, %arg1, %c0_i32, %c0_i32_0 : i32, i32, i32, i32
  }
}

module attributes {stable_mosaic.version = 11 : i64} {
  func.func @kernel(%arg0: i32, %arg1: i32, %arg2: memref<1x1x256xf32, #tpu.memory_space<vmem>>, %arg3: memref<1x1x256xf32, #tpu.memory_space<vmem>>, %arg4: memref<1x16x16xf32, #tpu.memory_space<vmem>>, %arg5: memref<1x1x256xf32, #tpu.memory_space<vmem>>) attributes {dimension_semantics = [#tpu.dimension_semantics<parallel>, #tpu.dimension_semantics<parallel>], iteration_bounds = array<i64: 2, 1>, scalar_prefetch = 0 : i64, scratch_operands = 0 : i64, tpu.core_type = #tpu.core_type<tc>, window_params = [{transform_indices = @transform_0, window_bounds = array<i64: 1, 1, 256>}, {transform_indices = @transform_1, window_bounds = array<i64: 1, 1, 256>}, {transform_indices = @transform_2, window_bounds = array<i64: 1, 16, 16>}, {transform_indices = @transform_3, window_bounds = array<i64: 1, 1, 256>}]} {
    %c0 = arith.constant 0 : index
    %c0_0 = arith.constant 0 : index
    %c0_1 = arith.constant 0 : index
    %0 = vector.load %arg2[%c0, %c0_0, %c0_1] : memref<1x1x256xf32, #tpu.memory_space<vmem>>, vector<1x1x256xf32>
    %1 = vector.shape_cast %0 : vector<1x1x256xf32> to vector<1x256xf32>
    %c0_2 = arith.constant 0 : index
    %c0_3 = arith.constant 0 : index
    %c0_4 = arith.constant 0 : index
    %2 = vector.load %arg3[%c0_2, %c0_3, %c0_4] : memref<1x1x256xf32, #tpu.memory_space<vmem>>, vector<1x1x256xf32>
    %3 = vector.shape_cast %2 : vector<1x1x256xf32> to vector<1x256xf32>
    %c0_5 = arith.constant 0 : index
    %c0_6 = arith.constant 0 : index
    %c0_7 = arith.constant 0 : index
    %4 = vector.load %arg4[%c0_5, %c0_6, %c0_7] : memref<1x16x16xf32, #tpu.memory_space<vmem>>, vector<1x16x16xf32>
    %5 = vector.shape_cast %4 : vector<1x16x16xf32> to vector<16x16xf32>
    %6 = tpu.iota {dimensions = array<i32: 0>} : vector<16x256xi32>
    %7 = arith.sitofp %6 : vector<16x256xi32> to vector<16x256xf32>
    %8 = tpu.iota {dimensions = array<i32: 0>} : vector<16x256xi32>
    %9 = arith.sitofp %8 : vector<16x256xi32> to vector<16x256xf32>
    %10 = vector.broadcast %1 : vector<1x256xf32> to vector<16x256xf32>
    %11 = arith.subf %10, %7 : vector<16x256xf32>
    %12 = math.absf %11 : vector<16x256xf32>
    %cst = arith.constant 1.000000e+00 : f32
    %13 = vector.broadcast %cst : f32 to vector<16x256xf32>
    %14 = arith.subf %13, %12 : vector<16x256xf32>
    %cst_8 = arith.constant 0.000000e+00 : f32
    %15 = vector.broadcast %cst_8 : f32 to vector<16x256xf32>
    %16 = arith.maximumf %15, %14 : vector<16x256xf32>
    %17 = vector.broadcast %3 : vector<1x256xf32> to vector<16x256xf32>
    %18 = arith.subf %17, %9 : vector<16x256xf32>
    %19 = math.absf %18 : vector<16x256xf32>
    %cst_9 = arith.constant 1.000000e+00 : f32
    %20 = vector.broadcast %cst_9 : f32 to vector<16x256xf32>
    %21 = arith.subf %20, %19 : vector<16x256xf32>
    %cst_10 = arith.constant 0.000000e+00 : f32
    %22 = vector.broadcast %cst_10 : f32 to vector<16x256xf32>
    %23 = arith.maximumf %22, %21 : vector<16x256xf32>
    %cst_11 = arith.constant dense<0.000000e+00> : vector<16x256xf32>
    %24 = tpu.matmul %5, %16, %cst_11 {dimension_numbers = #tpu.dot_dimension_numbers<[1], [0], [0], [1], [0, 0, 1, 1], [], []>} : vector<16x16xf32>, vector<16x256xf32>, vector<16x256xf32> -> vector<16x256xf32>
    %25 = arith.mulf %23, %24 : vector<16x256xf32>
    %cst_12 = arith.constant dense<0.000000e+00> : vector<256xf32>
    %26 = vector.multi_reduction <add>, %25, %cst_12 [0] : vector<16x256xf32> to vector<256xf32>
    %27 = vector.shape_cast %26 : vector<256xf32> to vector<1x256xf32>
    %c0_13 = arith.constant 0 : index
    %c0_14 = arith.constant 0 : index
    %c0_15 = arith.constant 0 : index
    %28 = vector.load %arg5[%c0_13, %c0_14, %c0_15] : memref<1x1x256xf32, #tpu.memory_space<vmem>>, vector<1x1x256xf32>
    %29 = vector.shape_cast %28 : vector<1x1x256xf32> to vector<1x256xf32>
    %30 = vector.shape_cast %27 : vector<1x256xf32> to vector<1x1x256xf32>
    tpu.vector_store %arg5[%c0_13, %c0_14, %c0_15], %30 {strides = array<i32>} : memref<1x1x256xf32, #tpu.memory_space<vmem>>, vector<1x1x256xf32>,
    return
  }
  func.func @transform_0(%arg0: i32, %arg1: i32) -> (i32, i32, i32) {
    %c0_i32 = arith.constant 0 : i32
    %c0_i32_0 = arith.constant 0 : i32
    return %arg0, %c0_i32, %arg1 : i32, i32, i32
  }
  func.func @transform_1(%arg0: i32, %arg1: i32) -> (i32, i32, i32) {
    %c0_i32 = arith.constant 0 : i32
    %c0_i32_0 = arith.constant 0 : i32
    return %arg0, %c0_i32, %arg1 : i32, i32, i32
  }
  func.func @transform_2(%arg0: i32, %arg1: i32) -> (i32, i32, i32) {
    %c0_i32 = arith.constant 0 : i32
    %c0_i32_0 = arith.constant 0 : i32
    %c0_i32_1 = arith.constant 0 : i32
    return %arg0, %c0_i32, %c0_i32_0 : i32, i32, i32
  }
  func.func @transform_3(%arg0: i32, %arg1: i32) -> (i32, i32, i32) {
    %c0_i32 = arith.constant 0 : i32
    %c0_i32_0 = arith.constant 0 : i32
    return %arg0, %c0_i32, %arg1 : i32, i32, i32
  }
}

module attributes {stable_mosaic.version = 11 : i64} {
  func.func @kernel(%arg0: i32, %arg1: memref<1x22x22xf32, #tpu.memory_space<vmem>>, %arg2: memref<1x22x22xf32, #tpu.memory_space<vmem>>, %arg3: memref<1x8x128xf32, #tpu.memory_space<vmem>>) attributes {dimension_semantics = [#tpu.dimension_semantics<parallel>], iteration_bounds = array<i64: 2>, scalar_prefetch = 0 : i64, scratch_operands = 0 : i64, tpu.core_type = #tpu.core_type<tc>, window_params = [{transform_indices = @transform_0, window_bounds = array<i64: 1, 22, 22>}, {transform_indices = @transform_1, window_bounds = array<i64: 1, 22, 22>}, {transform_indices = @transform_2, window_bounds = array<i64: 1, 8, 128>}]} {
    %c0 = arith.constant 0 : index
    %c0_0 = arith.constant 0 : index
    %c0_1 = arith.constant 0 : index
    %0 = vector.load %arg1[%c0, %c0_0, %c0_1] : memref<1x22x22xf32, #tpu.memory_space<vmem>>, vector<1x22x22xf32>
    %c0_2 = arith.constant 0 : index
    %c0_3 = arith.constant 0 : index
    %c0_4 = arith.constant 0 : index
    %1 = vector.load %arg2[%c0_2, %c0_3, %c0_4] : memref<1x22x22xf32, #tpu.memory_space<vmem>>, vector<1x22x22xf32>
    %2 = vector.extract_strided_slice %0 {offsets = [0, 0, 0], sizes = [1, 16, 22], strides = [1, 1, 1]} : vector<1x22x22xf32> to vector<1x16x22xf32>
    %cst = arith.constant 0.036632847 : f32
    %3 = vector.broadcast %cst : f32 to vector<1x16x22xf32>
    %4 = arith.mulf %3, %2 : vector<1x16x22xf32>
    %5 = vector.extract_strided_slice %0 {offsets = [0, 1, 0], sizes = [1, 16, 22], strides = [1, 1, 1]} : vector<1x22x22xf32> to vector<1x16x22xf32>
    %cst_5 = arith.constant 0.111280762 : f32
    %6 = vector.broadcast %cst_5 : f32 to vector<1x16x22xf32>
    %7 = arith.mulf %6, %5 : vector<1x16x22xf32>
    %8 = arith.addf %4, %7 : vector<1x16x22xf32>
    %9 = vector.extract_strided_slice %0 {offsets = [0, 2, 0], sizes = [1, 16, 22], strides = [1, 1, 1]} : vector<1x22x22xf32> to vector<1x16x22xf32>
    %cst_6 = arith.constant 0.216745317 : f32
    %10 = vector.broadcast %cst_6 : f32 to vector<1x16x22xf32>
    %11 = arith.mulf %10, %9 : vector<1x16x22xf32>
    %12 = arith.addf %8, %11 : vector<1x16x22xf32>
    %13 = vector.extract_strided_slice %0 {offsets = [0, 3, 0], sizes = [1, 16, 22], strides = [1, 1, 1]} : vector<1x22x22xf32> to vector<1x16x22xf32>
    %cst_7 = arith.constant 0.270682156 : f32
    %14 = vector.broadcast %cst_7 : f32 to vector<1x16x22xf32>
    %15 = arith.mulf %14, %13 : vector<1x16x22xf32>
    %16 = arith.addf %12, %15 : vector<1x16x22xf32>
    %17 = vector.extract_strided_slice %0 {offsets = [0, 4, 0], sizes = [1, 16, 22], strides = [1, 1, 1]} : vector<1x22x22xf32> to vector<1x16x22xf32>
    %cst_8 = arith.constant 0.216745317 : f32
    %18 = vector.broadcast %cst_8 : f32 to vector<1x16x22xf32>
    %19 = arith.mulf %18, %17 : vector<1x16x22xf32>
    %20 = arith.addf %16, %19 : vector<1x16x22xf32>
    %21 = vector.extract_strided_slice %0 {offsets = [0, 5, 0], sizes = [1, 16, 22], strides = [1, 1, 1]} : vector<1x22x22xf32> to vector<1x16x22xf32>
    %cst_9 = arith.constant 0.111280762 : f32
    %22 = vector.broadcast %cst_9 : f32 to vector<1x16x22xf32>
    %23 = arith.mulf %22, %21 : vector<1x16x22xf32>
    %24 = arith.addf %20, %23 : vector<1x16x22xf32>
    %25 = vector.extract_strided_slice %0 {offsets = [0, 6, 0], sizes = [1, 16, 22], strides = [1, 1, 1]} : vector<1x22x22xf32> to vector<1x16x22xf32>
    %cst_10 = arith.constant 0.036632847 : f32
    %26 = vector.broadcast %cst_10 : f32 to vector<1x16x22xf32>
    %27 = arith.mulf %26, %25 : vector<1x16x22xf32>
    %28 = arith.addf %24, %27 : vector<1x16x22xf32>
    %29 = vector.extract_strided_slice %28 {offsets = [0, 0, 0], sizes = [1, 16, 16], strides = [1, 1, 1]} : vector<1x16x22xf32> to vector<1x16x16xf32>
    %cst_11 = arith.constant 0.036632847 : f32
    %30 = vector.broadcast %cst_11 : f32 to vector<1x16x16xf32>
    %31 = arith.mulf %30, %29 : vector<1x16x16xf32>
    %32 = vector.extract_strided_slice %28 {offsets = [0, 0, 1], sizes = [1, 16, 16], strides = [1, 1, 1]} : vector<1x16x22xf32> to vector<1x16x16xf32>
    %cst_12 = arith.constant 0.111280762 : f32
    %33 = vector.broadcast %cst_12 : f32 to vector<1x16x16xf32>
    %34 = arith.mulf %33, %32 : vector<1x16x16xf32>
    %35 = arith.addf %31, %34 : vector<1x16x16xf32>
    %36 = vector.extract_strided_slice %28 {offsets = [0, 0, 2], sizes = [1, 16, 16], strides = [1, 1, 1]} : vector<1x16x22xf32> to vector<1x16x16xf32>
    %cst_13 = arith.constant 0.216745317 : f32
    %37 = vector.broadcast %cst_13 : f32 to vector<1x16x16xf32>
    %38 = arith.mulf %37, %36 : vector<1x16x16xf32>
    %39 = arith.addf %35, %38 : vector<1x16x16xf32>
    %40 = vector.extract_strided_slice %28 {offsets = [0, 0, 3], sizes = [1, 16, 16], strides = [1, 1, 1]} : vector<1x16x22xf32> to vector<1x16x16xf32>
    %cst_14 = arith.constant 0.270682156 : f32
    %41 = vector.broadcast %cst_14 : f32 to vector<1x16x16xf32>
    %42 = arith.mulf %41, %40 : vector<1x16x16xf32>
    %43 = arith.addf %39, %42 : vector<1x16x16xf32>
    %44 = vector.extract_strided_slice %28 {offsets = [0, 0, 4], sizes = [1, 16, 16], strides = [1, 1, 1]} : vector<1x16x22xf32> to vector<1x16x16xf32>
    %cst_15 = arith.constant 0.216745317 : f32
    %45 = vector.broadcast %cst_15 : f32 to vector<1x16x16xf32>
    %46 = arith.mulf %45, %44 : vector<1x16x16xf32>
    %47 = arith.addf %43, %46 : vector<1x16x16xf32>
    %48 = vector.extract_strided_slice %28 {offsets = [0, 0, 5], sizes = [1, 16, 16], strides = [1, 1, 1]} : vector<1x16x22xf32> to vector<1x16x16xf32>
    %cst_16 = arith.constant 0.111280762 : f32
    %49 = vector.broadcast %cst_16 : f32 to vector<1x16x16xf32>
    %50 = arith.mulf %49, %48 : vector<1x16x16xf32>
    %51 = arith.addf %47, %50 : vector<1x16x16xf32>
    %52 = vector.extract_strided_slice %28 {offsets = [0, 0, 6], sizes = [1, 16, 16], strides = [1, 1, 1]} : vector<1x16x22xf32> to vector<1x16x16xf32>
    %cst_17 = arith.constant 0.036632847 : f32
    %53 = vector.broadcast %cst_17 : f32 to vector<1x16x16xf32>
    %54 = arith.mulf %53, %52 : vector<1x16x16xf32>
    %55 = arith.addf %51, %54 : vector<1x16x16xf32>
    %56 = vector.extract_strided_slice %1 {offsets = [0, 0, 0], sizes = [1, 16, 22], strides = [1, 1, 1]} : vector<1x22x22xf32> to vector<1x16x22xf32>
    %cst_18 = arith.constant 0.036632847 : f32
    %57 = vector.broadcast %cst_18 : f32 to vector<1x16x22xf32>
    %58 = arith.mulf %57, %56 : vector<1x16x22xf32>
    %59 = vector.extract_strided_slice %1 {offsets = [0, 1, 0], sizes = [1, 16, 22], strides = [1, 1, 1]} : vector<1x22x22xf32> to vector<1x16x22xf32>
    %cst_19 = arith.constant 0.111280762 : f32
    %60 = vector.broadcast %cst_19 : f32 to vector<1x16x22xf32>
    %61 = arith.mulf %60, %59 : vector<1x16x22xf32>
    %62 = arith.addf %58, %61 : vector<1x16x22xf32>
    %63 = vector.extract_strided_slice %1 {offsets = [0, 2, 0], sizes = [1, 16, 22], strides = [1, 1, 1]} : vector<1x22x22xf32> to vector<1x16x22xf32>
    %cst_20 = arith.constant 0.216745317 : f32
    %64 = vector.broadcast %cst_20 : f32 to vector<1x16x22xf32>
    %65 = arith.mulf %64, %63 : vector<1x16x22xf32>
    %66 = arith.addf %62, %65 : vector<1x16x22xf32>
    %67 = vector.extract_strided_slice %1 {offsets = [0, 3, 0], sizes = [1, 16, 22], strides = [1, 1, 1]} : vector<1x22x22xf32> to vector<1x16x22xf32>
    %cst_21 = arith.constant 0.270682156 : f32
    %68 = vector.broadcast %cst_21 : f32 to vector<1x16x22xf32>
    %69 = arith.mulf %68, %67 : vector<1x16x22xf32>
    %70 = arith.addf %66, %69 : vector<1x16x22xf32>
    %71 = vector.extract_strided_slice %1 {offsets = [0, 4, 0], sizes = [1, 16, 22], strides = [1, 1, 1]} : vector<1x22x22xf32> to vector<1x16x22xf32>
    %cst_22 = arith.constant 0.216745317 : f32
    %72 = vector.broadcast %cst_22 : f32 to vector<1x16x22xf32>
    %73 = arith.mulf %72, %71 : vector<1x16x22xf32>
    %74 = arith.addf %70, %73 : vector<1x16x22xf32>
    %75 = vector.extract_strided_slice %1 {offsets = [0, 5, 0], sizes = [1, 16, 22], strides = [1, 1, 1]} : vector<1x22x22xf32> to vector<1x16x22xf32>
    %cst_23 = arith.constant 0.111280762 : f32
    %76 = vector.broadcast %cst_23 : f32 to vector<1x16x22xf32>
    %77 = arith.mulf %76, %75 : vector<1x16x22xf32>
    %78 = arith.addf %74, %77 : vector<1x16x22xf32>
    %79 = vector.extract_strided_slice %1 {offsets = [0, 6, 0], sizes = [1, 16, 22], strides = [1, 1, 1]} : vector<1x22x22xf32> to vector<1x16x22xf32>
    %cst_24 = arith.constant 0.036632847 : f32
    %80 = vector.broadcast %cst_24 : f32 to vector<1x16x22xf32>
    %81 = arith.mulf %80, %79 : vector<1x16x22xf32>
    %82 = arith.addf %78, %81 : vector<1x16x22xf32>
    %83 = vector.extract_strided_slice %82 {offsets = [0, 0, 0], sizes = [1, 16, 16], strides = [1, 1, 1]} : vector<1x16x22xf32> to vector<1x16x16xf32>
    %cst_25 = arith.constant 0.036632847 : f32
    %84 = vector.broadcast %cst_25 : f32 to vector<1x16x16xf32>
    %85 = arith.mulf %84, %83 : vector<1x16x16xf32>
    %86 = vector.extract_strided_slice %82 {offsets = [0, 0, 1], sizes = [1, 16, 16], strides = [1, 1, 1]} : vector<1x16x22xf32> to vector<1x16x16xf32>
    %cst_26 = arith.constant 0.111280762 : f32
    %87 = vector.broadcast %cst_26 : f32 to vector<1x16x16xf32>
    %88 = arith.mulf %87, %86 : vector<1x16x16xf32>
    %89 = arith.addf %85, %88 : vector<1x16x16xf32>
    %90 = vector.extract_strided_slice %82 {offsets = [0, 0, 2], sizes = [1, 16, 16], strides = [1, 1, 1]} : vector<1x16x22xf32> to vector<1x16x16xf32>
    %cst_27 = arith.constant 0.216745317 : f32
    %91 = vector.broadcast %cst_27 : f32 to vector<1x16x16xf32>
    %92 = arith.mulf %91, %90 : vector<1x16x16xf32>
    %93 = arith.addf %89, %92 : vector<1x16x16xf32>
    %94 = vector.extract_strided_slice %82 {offsets = [0, 0, 3], sizes = [1, 16, 16], strides = [1, 1, 1]} : vector<1x16x22xf32> to vector<1x16x16xf32>
    %cst_28 = arith.constant 0.270682156 : f32
    %95 = vector.broadcast %cst_28 : f32 to vector<1x16x16xf32>
    %96 = arith.mulf %95, %94 : vector<1x16x16xf32>
    %97 = arith.addf %93, %96 : vector<1x16x16xf32>
    %98 = vector.extract_strided_slice %82 {offsets = [0, 0, 4], sizes = [1, 16, 16], strides = [1, 1, 1]} : vector<1x16x22xf32> to vector<1x16x16xf32>
    %cst_29 = arith.constant 0.216745317 : f32
    %99 = vector.broadcast %cst_29 : f32 to vector<1x16x16xf32>
    %100 = arith.mulf %99, %98 : vector<1x16x16xf32>
    %101 = arith.addf %97, %100 : vector<1x16x16xf32>
    %102 = vector.extract_strided_slice %82 {offsets = [0, 0, 5], sizes = [1, 16, 16], strides = [1, 1, 1]} : vector<1x16x22xf32> to vector<1x16x16xf32>
    %cst_30 = arith.constant 0.111280762 : f32
    %103 = vector.broadcast %cst_30 : f32 to vector<1x16x16xf32>
    %104 = arith.mulf %103, %102 : vector<1x16x16xf32>
    %105 = arith.addf %101, %104 : vector<1x16x16xf32>
    %106 = vector.extract_strided_slice %82 {offsets = [0, 0, 6], sizes = [1, 16, 16], strides = [1, 1, 1]} : vector<1x16x22xf32> to vector<1x16x16xf32>
    %cst_31 = arith.constant 0.036632847 : f32
    %107 = vector.broadcast %cst_31 : f32 to vector<1x16x16xf32>
    %108 = arith.mulf %107, %106 : vector<1x16x16xf32>
    %109 = arith.addf %105, %108 : vector<1x16x16xf32>
    %110 = arith.mulf %0, %0 : vector<1x22x22xf32>
    %111 = vector.extract_strided_slice %110 {offsets = [0, 0, 0], sizes = [1, 16, 22], strides = [1, 1, 1]} : vector<1x22x22xf32> to vector<1x16x22xf32>
    %cst_32 = arith.constant 0.036632847 : f32
    %112 = vector.broadcast %cst_32 : f32 to vector<1x16x22xf32>
    %113 = arith.mulf %112, %111 : vector<1x16x22xf32>
    %114 = vector.extract_strided_slice %110 {offsets = [0, 1, 0], sizes = [1, 16, 22], strides = [1, 1, 1]} : vector<1x22x22xf32> to vector<1x16x22xf32>
    %cst_33 = arith.constant 0.111280762 : f32
    %115 = vector.broadcast %cst_33 : f32 to vector<1x16x22xf32>
    %116 = arith.mulf %115, %114 : vector<1x16x22xf32>
    %117 = arith.addf %113, %116 : vector<1x16x22xf32>
    %118 = vector.extract_strided_slice %110 {offsets = [0, 2, 0], sizes = [1, 16, 22], strides = [1, 1, 1]} : vector<1x22x22xf32> to vector<1x16x22xf32>
    %cst_34 = arith.constant 0.216745317 : f32
    %119 = vector.broadcast %cst_34 : f32 to vector<1x16x22xf32>
    %120 = arith.mulf %119, %118 : vector<1x16x22xf32>
    %121 = arith.addf %117, %120 : vector<1x16x22xf32>
    %122 = vector.extract_strided_slice %110 {offsets = [0, 3, 0], sizes = [1, 16, 22], strides = [1, 1, 1]} : vector<1x22x22xf32> to vector<1x16x22xf32>
    %cst_35 = arith.constant 0.270682156 : f32
    %123 = vector.broadcast %cst_35 : f32 to vector<1x16x22xf32>
    %124 = arith.mulf %123, %122 : vector<1x16x22xf32>
    %125 = arith.addf %121, %124 : vector<1x16x22xf32>
    %126 = vector.extract_strided_slice %110 {offsets = [0, 4, 0], sizes = [1, 16, 22], strides = [1, 1, 1]} : vector<1x22x22xf32> to vector<1x16x22xf32>
    %cst_36 = arith.constant 0.216745317 : f32
    %127 = vector.broadcast %cst_36 : f32 to vector<1x16x22xf32>
    %128 = arith.mulf %127, %126 : vector<1x16x22xf32>
    %129 = arith.addf %125, %128 : vector<1x16x22xf32>
    %130 = vector.extract_strided_slice %110 {offsets = [0, 5, 0], sizes = [1, 16, 22], strides = [1, 1, 1]} : vector<1x22x22xf32> to vector<1x16x22xf32>
    %cst_37 = arith.constant 0.111280762 : f32
    %131 = vector.broadcast %cst_37 : f32 to vector<1x16x22xf32>
    %132 = arith.mulf %131, %130 : vector<1x16x22xf32>
    %133 = arith.addf %129, %132 : vector<1x16x22xf32>
    %134 = vector.extract_strided_slice %110 {offsets = [0, 6, 0], sizes = [1, 16, 22], strides = [1, 1, 1]} : vector<1x22x22xf32> to vector<1x16x22xf32>
    %cst_38 = arith.constant 0.036632847 : f32
    %135 = vector.broadcast %cst_38 : f32 to vector<1x16x22xf32>
    %136 = arith.mulf %135, %134 : vector<1x16x22xf32>
    %137 = arith.addf %133, %136 : vector<1x16x22xf32>
    %138 = vector.extract_strided_slice %137 {offsets = [0, 0, 0], sizes = [1, 16, 16], strides = [1, 1, 1]} : vector<1x16x22xf32> to vector<1x16x16xf32>
    %cst_39 = arith.constant 0.036632847 : f32
    %139 = vector.broadcast %cst_39 : f32 to vector<1x16x16xf32>
    %140 = arith.mulf %139, %138 : vector<1x16x16xf32>
    %141 = vector.extract_strided_slice %137 {offsets = [0, 0, 1], sizes = [1, 16, 16], strides = [1, 1, 1]} : vector<1x16x22xf32> to vector<1x16x16xf32>
    %cst_40 = arith.constant 0.111280762 : f32
    %142 = vector.broadcast %cst_40 : f32 to vector<1x16x16xf32>
    %143 = arith.mulf %142, %141 : vector<1x16x16xf32>
    %144 = arith.addf %140, %143 : vector<1x16x16xf32>
    %145 = vector.extract_strided_slice %137 {offsets = [0, 0, 2], sizes = [1, 16, 16], strides = [1, 1, 1]} : vector<1x16x22xf32> to vector<1x16x16xf32>
    %cst_41 = arith.constant 0.216745317 : f32
    %146 = vector.broadcast %cst_41 : f32 to vector<1x16x16xf32>
    %147 = arith.mulf %146, %145 : vector<1x16x16xf32>
    %148 = arith.addf %144, %147 : vector<1x16x16xf32>
    %149 = vector.extract_strided_slice %137 {offsets = [0, 0, 3], sizes = [1, 16, 16], strides = [1, 1, 1]} : vector<1x16x22xf32> to vector<1x16x16xf32>
    %cst_42 = arith.constant 0.270682156 : f32
    %150 = vector.broadcast %cst_42 : f32 to vector<1x16x16xf32>
    %151 = arith.mulf %150, %149 : vector<1x16x16xf32>
    %152 = arith.addf %148, %151 : vector<1x16x16xf32>
    %153 = vector.extract_strided_slice %137 {offsets = [0, 0, 4], sizes = [1, 16, 16], strides = [1, 1, 1]} : vector<1x16x22xf32> to vector<1x16x16xf32>
    %cst_43 = arith.constant 0.216745317 : f32
    %154 = vector.broadcast %cst_43 : f32 to vector<1x16x16xf32>
    %155 = arith.mulf %154, %153 : vector<1x16x16xf32>
    %156 = arith.addf %152, %155 : vector<1x16x16xf32>
    %157 = vector.extract_strided_slice %137 {offsets = [0, 0, 5], sizes = [1, 16, 16], strides = [1, 1, 1]} : vector<1x16x22xf32> to vector<1x16x16xf32>
    %cst_44 = arith.constant 0.111280762 : f32
    %158 = vector.broadcast %cst_44 : f32 to vector<1x16x16xf32>
    %159 = arith.mulf %158, %157 : vector<1x16x16xf32>
    %160 = arith.addf %156, %159 : vector<1x16x16xf32>
    %161 = vector.extract_strided_slice %137 {offsets = [0, 0, 6], sizes = [1, 16, 16], strides = [1, 1, 1]} : vector<1x16x22xf32> to vector<1x16x16xf32>
    %cst_45 = arith.constant 0.036632847 : f32
    %162 = vector.broadcast %cst_45 : f32 to vector<1x16x16xf32>
    %163 = arith.mulf %162, %161 : vector<1x16x16xf32>
    %164 = arith.addf %160, %163 : vector<1x16x16xf32>
    %165 = arith.mulf %1, %1 : vector<1x22x22xf32>
    %166 = vector.extract_strided_slice %165 {offsets = [0, 0, 0], sizes = [1, 16, 22], strides = [1, 1, 1]} : vector<1x22x22xf32> to vector<1x16x22xf32>
    %cst_46 = arith.constant 0.036632847 : f32
    %167 = vector.broadcast %cst_46 : f32 to vector<1x16x22xf32>
    %168 = arith.mulf %167, %166 : vector<1x16x22xf32>
    %169 = vector.extract_strided_slice %165 {offsets = [0, 1, 0], sizes = [1, 16, 22], strides = [1, 1, 1]} : vector<1x22x22xf32> to vector<1x16x22xf32>
    %cst_47 = arith.constant 0.111280762 : f32
    %170 = vector.broadcast %cst_47 : f32 to vector<1x16x22xf32>
    %171 = arith.mulf %170, %169 : vector<1x16x22xf32>
    %172 = arith.addf %168, %171 : vector<1x16x22xf32>
    %173 = vector.extract_strided_slice %165 {offsets = [0, 2, 0], sizes = [1, 16, 22], strides = [1, 1, 1]} : vector<1x22x22xf32> to vector<1x16x22xf32>
    %cst_48 = arith.constant 0.216745317 : f32
    %174 = vector.broadcast %cst_48 : f32 to vector<1x16x22xf32>
    %175 = arith.mulf %174, %173 : vector<1x16x22xf32>
    %176 = arith.addf %172, %175 : vector<1x16x22xf32>
    %177 = vector.extract_strided_slice %165 {offsets = [0, 3, 0], sizes = [1, 16, 22], strides = [1, 1, 1]} : vector<1x22x22xf32> to vector<1x16x22xf32>
    %cst_49 = arith.constant 0.270682156 : f32
    %178 = vector.broadcast %cst_49 : f32 to vector<1x16x22xf32>
    %179 = arith.mulf %178, %177 : vector<1x16x22xf32>
    %180 = arith.addf %176, %179 : vector<1x16x22xf32>
    %181 = vector.extract_strided_slice %165 {offsets = [0, 4, 0], sizes = [1, 16, 22], strides = [1, 1, 1]} : vector<1x22x22xf32> to vector<1x16x22xf32>
    %cst_50 = arith.constant 0.216745317 : f32
    %182 = vector.broadcast %cst_50 : f32 to vector<1x16x22xf32>
    %183 = arith.mulf %182, %181 : vector<1x16x22xf32>
    %184 = arith.addf %180, %183 : vector<1x16x22xf32>
    %185 = vector.extract_strided_slice %165 {offsets = [0, 5, 0], sizes = [1, 16, 22], strides = [1, 1, 1]} : vector<1x22x22xf32> to vector<1x16x22xf32>
    %cst_51 = arith.constant 0.111280762 : f32
    %186 = vector.broadcast %cst_51 : f32 to vector<1x16x22xf32>
    %187 = arith.mulf %186, %185 : vector<1x16x22xf32>
    %188 = arith.addf %184, %187 : vector<1x16x22xf32>
    %189 = vector.extract_strided_slice %165 {offsets = [0, 6, 0], sizes = [1, 16, 22], strides = [1, 1, 1]} : vector<1x22x22xf32> to vector<1x16x22xf32>
    %cst_52 = arith.constant 0.036632847 : f32
    %190 = vector.broadcast %cst_52 : f32 to vector<1x16x22xf32>
    %191 = arith.mulf %190, %189 : vector<1x16x22xf32>
    %192 = arith.addf %188, %191 : vector<1x16x22xf32>
    %193 = vector.extract_strided_slice %192 {offsets = [0, 0, 0], sizes = [1, 16, 16], strides = [1, 1, 1]} : vector<1x16x22xf32> to vector<1x16x16xf32>
    %cst_53 = arith.constant 0.036632847 : f32
    %194 = vector.broadcast %cst_53 : f32 to vector<1x16x16xf32>
    %195 = arith.mulf %194, %193 : vector<1x16x16xf32>
    %196 = vector.extract_strided_slice %192 {offsets = [0, 0, 1], sizes = [1, 16, 16], strides = [1, 1, 1]} : vector<1x16x22xf32> to vector<1x16x16xf32>
    %cst_54 = arith.constant 0.111280762 : f32
    %197 = vector.broadcast %cst_54 : f32 to vector<1x16x16xf32>
    %198 = arith.mulf %197, %196 : vector<1x16x16xf32>
    %199 = arith.addf %195, %198 : vector<1x16x16xf32>
    %200 = vector.extract_strided_slice %192 {offsets = [0, 0, 2], sizes = [1, 16, 16], strides = [1, 1, 1]} : vector<1x16x22xf32> to vector<1x16x16xf32>
    %cst_55 = arith.constant 0.216745317 : f32
    %201 = vector.broadcast %cst_55 : f32 to vector<1x16x16xf32>
    %202 = arith.mulf %201, %200 : vector<1x16x16xf32>
    %203 = arith.addf %199, %202 : vector<1x16x16xf32>
    %204 = vector.extract_strided_slice %192 {offsets = [0, 0, 3], sizes = [1, 16, 16], strides = [1, 1, 1]} : vector<1x16x22xf32> to vector<1x16x16xf32>
    %cst_56 = arith.constant 0.270682156 : f32
    %205 = vector.broadcast %cst_56 : f32 to vector<1x16x16xf32>
    %206 = arith.mulf %205, %204 : vector<1x16x16xf32>
    %207 = arith.addf %203, %206 : vector<1x16x16xf32>
    %208 = vector.extract_strided_slice %192 {offsets = [0, 0, 4], sizes = [1, 16, 16], strides = [1, 1, 1]} : vector<1x16x22xf32> to vector<1x16x16xf32>
    %cst_57 = arith.constant 0.216745317 : f32
    %209 = vector.broadcast %cst_57 : f32 to vector<1x16x16xf32>
    %210 = arith.mulf %209, %208 : vector<1x16x16xf32>
    %211 = arith.addf %207, %210 : vector<1x16x16xf32>
    %212 = vector.extract_strided_slice %192 {offsets = [0, 0, 5], sizes = [1, 16, 16], strides = [1, 1, 1]} : vector<1x16x22xf32> to vector<1x16x16xf32>
    %cst_58 = arith.constant 0.111280762 : f32
    %213 = vector.broadcast %cst_58 : f32 to vector<1x16x16xf32>
    %214 = arith.mulf %213, %212 : vector<1x16x16xf32>
    %215 = arith.addf %211, %214 : vector<1x16x16xf32>
    %216 = vector.extract_strided_slice %192 {offsets = [0, 0, 6], sizes = [1, 16, 16], strides = [1, 1, 1]} : vector<1x16x22xf32> to vector<1x16x16xf32>
    %cst_59 = arith.constant 0.036632847 : f32
    %217 = vector.broadcast %cst_59 : f32 to vector<1x16x16xf32>
    %218 = arith.mulf %217, %216 : vector<1x16x16xf32>
    %219 = arith.addf %215, %218 : vector<1x16x16xf32>
    %220 = arith.mulf %0, %1 : vector<1x22x22xf32>
    %221 = vector.extract_strided_slice %220 {offsets = [0, 0, 0], sizes = [1, 16, 22], strides = [1, 1, 1]} : vector<1x22x22xf32> to vector<1x16x22xf32>
    %cst_60 = arith.constant 0.036632847 : f32
    %222 = vector.broadcast %cst_60 : f32 to vector<1x16x22xf32>
    %223 = arith.mulf %222, %221 : vector<1x16x22xf32>
    %224 = vector.extract_strided_slice %220 {offsets = [0, 1, 0], sizes = [1, 16, 22], strides = [1, 1, 1]} : vector<1x22x22xf32> to vector<1x16x22xf32>
    %cst_61 = arith.constant 0.111280762 : f32
    %225 = vector.broadcast %cst_61 : f32 to vector<1x16x22xf32>
    %226 = arith.mulf %225, %224 : vector<1x16x22xf32>
    %227 = arith.addf %223, %226 : vector<1x16x22xf32>
    %228 = vector.extract_strided_slice %220 {offsets = [0, 2, 0], sizes = [1, 16, 22], strides = [1, 1, 1]} : vector<1x22x22xf32> to vector<1x16x22xf32>
    %cst_62 = arith.constant 0.216745317 : f32
    %229 = vector.broadcast %cst_62 : f32 to vector<1x16x22xf32>
    %230 = arith.mulf %229, %228 : vector<1x16x22xf32>
    %231 = arith.addf %227, %230 : vector<1x16x22xf32>
    %232 = vector.extract_strided_slice %220 {offsets = [0, 3, 0], sizes = [1, 16, 22], strides = [1, 1, 1]} : vector<1x22x22xf32> to vector<1x16x22xf32>
    %cst_63 = arith.constant 0.270682156 : f32
    %233 = vector.broadcast %cst_63 : f32 to vector<1x16x22xf32>
    %234 = arith.mulf %233, %232 : vector<1x16x22xf32>
    %235 = arith.addf %231, %234 : vector<1x16x22xf32>
    %236 = vector.extract_strided_slice %220 {offsets = [0, 4, 0], sizes = [1, 16, 22], strides = [1, 1, 1]} : vector<1x22x22xf32> to vector<1x16x22xf32>
    %cst_64 = arith.constant 0.216745317 : f32
    %237 = vector.broadcast %cst_64 : f32 to vector<1x16x22xf32>
    %238 = arith.mulf %237, %236 : vector<1x16x22xf32>
    %239 = arith.addf %235, %238 : vector<1x16x22xf32>
    %240 = vector.extract_strided_slice %220 {offsets = [0, 5, 0], sizes = [1, 16, 22], strides = [1, 1, 1]} : vector<1x22x22xf32> to vector<1x16x22xf32>
    %cst_65 = arith.constant 0.111280762 : f32
    %241 = vector.broadcast %cst_65 : f32 to vector<1x16x22xf32>
    %242 = arith.mulf %241, %240 : vector<1x16x22xf32>
    %243 = arith.addf %239, %242 : vector<1x16x22xf32>
    %244 = vector.extract_strided_slice %220 {offsets = [0, 6, 0], sizes = [1, 16, 22], strides = [1, 1, 1]} : vector<1x22x22xf32> to vector<1x16x22xf32>
    %cst_66 = arith.constant 0.036632847 : f32
    %245 = vector.broadcast %cst_66 : f32 to vector<1x16x22xf32>
    %246 = arith.mulf %245, %244 : vector<1x16x22xf32>
    %247 = arith.addf %243, %246 : vector<1x16x22xf32>
    %248 = vector.extract_strided_slice %247 {offsets = [0, 0, 0], sizes = [1, 16, 16], strides = [1, 1, 1]} : vector<1x16x22xf32> to vector<1x16x16xf32>
    %cst_67 = arith.constant 0.036632847 : f32
    %249 = vector.broadcast %cst_67 : f32 to vector<1x16x16xf32>
    %250 = arith.mulf %249, %248 : vector<1x16x16xf32>
    %251 = vector.extract_strided_slice %247 {offsets = [0, 0, 1], sizes = [1, 16, 16], strides = [1, 1, 1]} : vector<1x16x22xf32> to vector<1x16x16xf32>
    %cst_68 = arith.constant 0.111280762 : f32
    %252 = vector.broadcast %cst_68 : f32 to vector<1x16x16xf32>
    %253 = arith.mulf %252, %251 : vector<1x16x16xf32>
    %254 = arith.addf %250, %253 : vector<1x16x16xf32>
    %255 = vector.extract_strided_slice %247 {offsets = [0, 0, 2], sizes = [1, 16, 16], strides = [1, 1, 1]} : vector<1x16x22xf32> to vector<1x16x16xf32>
    %cst_69 = arith.constant 0.216745317 : f32
    %256 = vector.broadcast %cst_69 : f32 to vector<1x16x16xf32>
    %257 = arith.mulf %256, %255 : vector<1x16x16xf32>
    %258 = arith.addf %254, %257 : vector<1x16x16xf32>
    %259 = vector.extract_strided_slice %247 {offsets = [0, 0, 3], sizes = [1, 16, 16], strides = [1, 1, 1]} : vector<1x16x22xf32> to vector<1x16x16xf32>
    %cst_70 = arith.constant 0.270682156 : f32
    %260 = vector.broadcast %cst_70 : f32 to vector<1x16x16xf32>
    %261 = arith.mulf %260, %259 : vector<1x16x16xf32>
    %262 = arith.addf %258, %261 : vector<1x16x16xf32>
    %263 = vector.extract_strided_slice %247 {offsets = [0, 0, 4], sizes = [1, 16, 16], strides = [1, 1, 1]} : vector<1x16x22xf32> to vector<1x16x16xf32>
    %cst_71 = arith.constant 0.216745317 : f32
    %264 = vector.broadcast %cst_71 : f32 to vector<1x16x16xf32>
    %265 = arith.mulf %264, %263 : vector<1x16x16xf32>
    %266 = arith.addf %262, %265 : vector<1x16x16xf32>
    %267 = vector.extract_strided_slice %247 {offsets = [0, 0, 5], sizes = [1, 16, 16], strides = [1, 1, 1]} : vector<1x16x22xf32> to vector<1x16x16xf32>
    %cst_72 = arith.constant 0.111280762 : f32
    %268 = vector.broadcast %cst_72 : f32 to vector<1x16x16xf32>
    %269 = arith.mulf %268, %267 : vector<1x16x16xf32>
    %270 = arith.addf %266, %269 : vector<1x16x16xf32>
    %271 = vector.extract_strided_slice %247 {offsets = [0, 0, 6], sizes = [1, 16, 16], strides = [1, 1, 1]} : vector<1x16x22xf32> to vector<1x16x16xf32>
    %cst_73 = arith.constant 0.036632847 : f32
    %272 = vector.broadcast %cst_73 : f32 to vector<1x16x16xf32>
    %273 = arith.mulf %272, %271 : vector<1x16x16xf32>
    %274 = arith.addf %270, %273 : vector<1x16x16xf32>
    %275 = arith.mulf %55, %55 : vector<1x16x16xf32>
    %276 = arith.mulf %109, %109 : vector<1x16x16xf32>
    %277 = arith.mulf %55, %109 : vector<1x16x16xf32>
    %278 = arith.subf %164, %275 : vector<1x16x16xf32>
    %279 = arith.subf %219, %276 : vector<1x16x16xf32>
    %280 = arith.subf %274, %277 : vector<1x16x16xf32>
    %cst_74 = arith.constant 2.000000e+00 : f32
    %281 = vector.broadcast %cst_74 : f32 to vector<1x16x16xf32>
    %282 = arith.mulf %281, %277 : vector<1x16x16xf32>
    %cst_75 = arith.constant 9.99999974E-5 : f32
    %283 = vector.broadcast %cst_75 : f32 to vector<1x16x16xf32>
    %284 = arith.addf %282, %283 : vector<1x16x16xf32>
    %cst_76 = arith.constant 2.000000e+00 : f32
    %285 = vector.broadcast %cst_76 : f32 to vector<1x16x16xf32>
    %286 = arith.mulf %285, %280 : vector<1x16x16xf32>
    %cst_77 = arith.constant 8.99999984E-4 : f32
    %287 = vector.broadcast %cst_77 : f32 to vector<1x16x16xf32>
    %288 = arith.addf %286, %287 : vector<1x16x16xf32>
    %289 = arith.mulf %284, %288 : vector<1x16x16xf32>
    %290 = arith.addf %275, %276 : vector<1x16x16xf32>
    %cst_78 = arith.constant 9.99999974E-5 : f32
    %291 = vector.broadcast %cst_78 : f32 to vector<1x16x16xf32>
    %292 = arith.addf %290, %291 : vector<1x16x16xf32>
    %293 = arith.addf %278, %279 : vector<1x16x16xf32>
    %cst_79 = arith.constant 8.99999984E-4 : f32
    %294 = vector.broadcast %cst_79 : f32 to vector<1x16x16xf32>
    %295 = arith.addf %293, %294 : vector<1x16x16xf32>
    %296 = arith.mulf %292, %295 : vector<1x16x16xf32>
    %297 = arith.divf %289, %296 : vector<1x16x16xf32>
    %cst_80 = arith.constant dense<0.000000e+00> : vector<1x16xf32>
    %298 = vector.multi_reduction <add>, %297, %cst_80 [2] : vector<1x16x16xf32> to vector<1x16xf32>
    %299 = vector.shape_cast %298 : vector<1x16xf32> to vector<1x16x1xf32>
    %cst_81 = arith.constant dense<0.000000e+00> : vector<1x1xf32>
    %300 = vector.multi_reduction <add>, %299, %cst_81 [1] : vector<1x16x1xf32> to vector<1x1xf32>
    %301 = vector.shape_cast %300 : vector<1x1xf32> to vector<1x1x1xf32>
    %cst_82 = arith.constant dense<0.000000e+00> : vector<1x1xf32>
    %302 = vector.multi_reduction <add>, %301, %cst_82 [0] : vector<1x1x1xf32> to vector<1x1xf32>
    %303 = vector.shape_cast %302 : vector<1x1xf32> to vector<1x1x1xf32>
    %304 = vector.shape_cast %303 : vector<1x1x1xf32> to vector<1x1xf32>
    %305 = vector.shape_cast %304 : vector<1x1xf32> to vector<1x1xf32>
    %306 = vector.broadcast %305 : vector<1x1xf32> to vector<8x128xf32>
    %c0_83 = arith.constant 0 : index
    %c0_84 = arith.constant 0 : index
    %c0_85 = arith.constant 0 : index
    %307 = vector.load %arg3[%c0_83, %c0_84, %c0_85] : memref<1x8x128xf32, #tpu.memory_space<vmem>>, vector<1x8x128xf32>
    %308 = vector.shape_cast %307 : vector<1x8x128xf32> to vector<8x128xf32>
    %309 = vector.shape_cast %306 : vector<8x128xf32> to vector<1x8x128xf32>
    tpu.vector_store %arg3[%c0_83, %c0_84, %c0_85], %309 {strides = array<i32>} : memref<1x8x128xf32, #tpu.memory_space<vmem>>, vector<1x8x128xf32>,
    return
  }
  func.func @transform_0(%arg0: i32) -> (i32, i32, i32) {
    %c0_i32 = arith.constant 0 : i32
    %c0_i32_0 = arith.constant 0 : i32
    %c0_i32_1 = arith.constant 0 : i32
    return %arg0, %c0_i32, %c0_i32_0 : i32, i32, i32
  }
  func.func @transform_1(%arg0: i32) -> (i32, i32, i32) {
    %c0_i32 = arith.constant 0 : i32
    %c0_i32_0 = arith.constant 0 : i32
    %c0_i32_1 = arith.constant 0 : i32
    return %arg0, %c0_i32, %c0_i32_0 : i32, i32, i32
  }
  func.func @transform_2(%arg0: i32) -> (i32, i32, i32) {
    %c0_i32 = arith.constant 0 : i32
    %c0_i32_0 = arith.constant 0 : i32
    %c0_i32_1 = arith.constant 0 : i32
    return %arg0, %c0_i32, %c0_i32_0 : i32, i32, i32
  }
}

module attributes {stable_mosaic.version = 11 : i64} {
  func.func @kernel(%arg0: i32, %arg1: memref<2x20x20xf32, #tpu.memory_space<vmem>>, %arg2: memref<2x16x16xf32, #tpu.memory_space<vmem>>) attributes {dimension_semantics = [#tpu.dimension_semantics<parallel>], iteration_bounds = array<i64: 2>, scalar_prefetch = 0 : i64, scratch_operands = 0 : i64, tpu.core_type = #tpu.core_type<tc>, window_params = [{transform_indices = @transform_0, window_bounds = array<i64: 2, 20, 20>}, {transform_indices = @transform_1, window_bounds = array<i64: 2, 16, 16>}]} {
    %c0 = arith.constant 0 : index
    %c0_0 = arith.constant 0 : index
    %c0_1 = arith.constant 0 : index
    %0 = vector.load %arg1[%c0, %c0_0, %c0_1] : memref<2x20x20xf32, #tpu.memory_space<vmem>>, vector<2x20x20xf32>
    %1 = vector.extract_strided_slice %0 {offsets = [0, 0, 0], sizes = [2, 16, 20], strides = [1, 1, 1]} : vector<2x20x20xf32> to vector<2x16x20xf32>
    %cst = arith.constant 0.196882486 : f32
    %2 = vector.broadcast %cst : f32 to vector<2x16x20xf32>
    %3 = arith.mulf %2, %1 : vector<2x16x20xf32>
    %4 = vector.extract_strided_slice %0 {offsets = [0, 1, 0], sizes = [2, 16, 20], strides = [1, 1, 1]} : vector<2x20x20xf32> to vector<2x16x20xf32>
    %cst_2 = arith.constant 0.201551422 : f32
    %5 = vector.broadcast %cst_2 : f32 to vector<2x16x20xf32>
    %6 = arith.mulf %5, %4 : vector<2x16x20xf32>
    %7 = arith.addf %3, %6 : vector<2x16x20xf32>
    %8 = vector.extract_strided_slice %0 {offsets = [0, 2, 0], sizes = [2, 16, 20], strides = [1, 1, 1]} : vector<2x20x20xf32> to vector<2x16x20xf32>
    %cst_3 = arith.constant 0.203132197 : f32
    %9 = vector.broadcast %cst_3 : f32 to vector<2x16x20xf32>
    %10 = arith.mulf %9, %8 : vector<2x16x20xf32>
    %11 = arith.addf %7, %10 : vector<2x16x20xf32>
    %12 = vector.extract_strided_slice %0 {offsets = [0, 3, 0], sizes = [2, 16, 20], strides = [1, 1, 1]} : vector<2x20x20xf32> to vector<2x16x20xf32>
    %cst_4 = arith.constant 0.201551422 : f32
    %13 = vector.broadcast %cst_4 : f32 to vector<2x16x20xf32>
    %14 = arith.mulf %13, %12 : vector<2x16x20xf32>
    %15 = arith.addf %11, %14 : vector<2x16x20xf32>
    %16 = vector.extract_strided_slice %0 {offsets = [0, 4, 0], sizes = [2, 16, 20], strides = [1, 1, 1]} : vector<2x20x20xf32> to vector<2x16x20xf32>
    %cst_5 = arith.constant 0.196882486 : f32
    %17 = vector.broadcast %cst_5 : f32 to vector<2x16x20xf32>
    %18 = arith.mulf %17, %16 : vector<2x16x20xf32>
    %19 = arith.addf %15, %18 : vector<2x16x20xf32>
    %20 = vector.extract_strided_slice %19 {offsets = [0, 0, 0], sizes = [2, 16, 16], strides = [1, 1, 1]} : vector<2x16x20xf32> to vector<2x16x16xf32>
    %cst_6 = arith.constant 0.196882486 : f32
    %21 = vector.broadcast %cst_6 : f32 to vector<2x16x16xf32>
    %22 = arith.mulf %21, %20 : vector<2x16x16xf32>
    %23 = vector.extract_strided_slice %19 {offsets = [0, 0, 1], sizes = [2, 16, 16], strides = [1, 1, 1]} : vector<2x16x20xf32> to vector<2x16x16xf32>
    %cst_7 = arith.constant 0.201551422 : f32
    %24 = vector.broadcast %cst_7 : f32 to vector<2x16x16xf32>
    %25 = arith.mulf %24, %23 : vector<2x16x16xf32>
    %26 = arith.addf %22, %25 : vector<2x16x16xf32>
    %27 = vector.extract_strided_slice %19 {offsets = [0, 0, 2], sizes = [2, 16, 16], strides = [1, 1, 1]} : vector<2x16x20xf32> to vector<2x16x16xf32>
    %cst_8 = arith.constant 0.203132197 : f32
    %28 = vector.broadcast %cst_8 : f32 to vector<2x16x16xf32>
    %29 = arith.mulf %28, %27 : vector<2x16x16xf32>
    %30 = arith.addf %26, %29 : vector<2x16x16xf32>
    %31 = vector.extract_strided_slice %19 {offsets = [0, 0, 3], sizes = [2, 16, 16], strides = [1, 1, 1]} : vector<2x16x20xf32> to vector<2x16x16xf32>
    %cst_9 = arith.constant 0.201551422 : f32
    %32 = vector.broadcast %cst_9 : f32 to vector<2x16x16xf32>
    %33 = arith.mulf %32, %31 : vector<2x16x16xf32>
    %34 = arith.addf %30, %33 : vector<2x16x16xf32>
    %35 = vector.extract_strided_slice %19 {offsets = [0, 0, 4], sizes = [2, 16, 16], strides = [1, 1, 1]} : vector<2x16x20xf32> to vector<2x16x16xf32>
    %cst_10 = arith.constant 0.196882486 : f32
    %36 = vector.broadcast %cst_10 : f32 to vector<2x16x16xf32>
    %37 = arith.mulf %36, %35 : vector<2x16x16xf32>
    %38 = arith.addf %34, %37 : vector<2x16x16xf32>
    %c0_11 = arith.constant 0 : index
    %c0_12 = arith.constant 0 : index
    %c0_13 = arith.constant 0 : index
    %39 = vector.load %arg2[%c0_11, %c0_12, %c0_13] : memref<2x16x16xf32, #tpu.memory_space<vmem>>, vector<2x16x16xf32>
    tpu.vector_store %arg2[%c0_11, %c0_12, %c0_13], %38 {strides = array<i32>} : memref<2x16x16xf32, #tpu.memory_space<vmem>>, vector<2x16x16xf32>,
    return
  }
  func.func @transform_0(%arg0: i32) -> (i32, i32, i32) {
    %c0_i32 = arith.constant 0 : i32
    %c0_i32_0 = arith.constant 0 : i32
    %c0_i32_1 = arith.constant 0 : i32
    return %arg0, %c0_i32, %c0_i32_0 : i32, i32, i32
  }
  func.func @transform_1(%arg0: i32) -> (i32, i32, i32) {
    %c0_i32 = arith.constant 0 : i32
    %c0_i32_0 = arith.constant 0 : i32
    %c0_i32_1 = arith.constant 0 : i32
    return %arg0, %c0_i32, %c0_i32_0 : i32, i32, i32
  }
}

module attributes {stable_mosaic.version = 11 : i64} {
  func.func @kernel(%arg0: i32, %arg1: memref<2x20x20xf32, #tpu.memory_space<vmem>>, %arg2: memref<2x16x16xf32, #tpu.memory_space<vmem>>, %arg3: memref<1x8x128xf32, #tpu.memory_space<vmem>>) attributes {dimension_semantics = [#tpu.dimension_semantics<parallel>], iteration_bounds = array<i64: 2>, scalar_prefetch = 0 : i64, scratch_operands = 0 : i64, tpu.core_type = #tpu.core_type<tc>, window_params = [{transform_indices = @transform_0, window_bounds = array<i64: 2, 20, 20>}, {transform_indices = @transform_1, window_bounds = array<i64: 2, 16, 16>}, {transform_indices = @transform_2, window_bounds = array<i64: 1, 8, 128>}]} {
    %c0 = arith.constant 0 : index
    %c0_0 = arith.constant 0 : index
    %c0_1 = arith.constant 0 : index
    %0 = vector.load %arg1[%c0, %c0_0, %c0_1] : memref<2x20x20xf32, #tpu.memory_space<vmem>>, vector<2x20x20xf32>
    %1 = vector.extract_strided_slice %0 {offsets = [0, 0, 0], sizes = [2, 16, 20], strides = [1, 1, 1]} : vector<2x20x20xf32> to vector<2x16x20xf32>
    %cst = arith.constant 0.196882486 : f32
    %2 = vector.broadcast %cst : f32 to vector<2x16x20xf32>
    %3 = arith.mulf %2, %1 : vector<2x16x20xf32>
    %4 = vector.extract_strided_slice %0 {offsets = [0, 1, 0], sizes = [2, 16, 20], strides = [1, 1, 1]} : vector<2x20x20xf32> to vector<2x16x20xf32>
    %cst_2 = arith.constant 0.201551422 : f32
    %5 = vector.broadcast %cst_2 : f32 to vector<2x16x20xf32>
    %6 = arith.mulf %5, %4 : vector<2x16x20xf32>
    %7 = arith.addf %3, %6 : vector<2x16x20xf32>
    %8 = vector.extract_strided_slice %0 {offsets = [0, 2, 0], sizes = [2, 16, 20], strides = [1, 1, 1]} : vector<2x20x20xf32> to vector<2x16x20xf32>
    %cst_3 = arith.constant 0.203132197 : f32
    %9 = vector.broadcast %cst_3 : f32 to vector<2x16x20xf32>
    %10 = arith.mulf %9, %8 : vector<2x16x20xf32>
    %11 = arith.addf %7, %10 : vector<2x16x20xf32>
    %12 = vector.extract_strided_slice %0 {offsets = [0, 3, 0], sizes = [2, 16, 20], strides = [1, 1, 1]} : vector<2x20x20xf32> to vector<2x16x20xf32>
    %cst_4 = arith.constant 0.201551422 : f32
    %13 = vector.broadcast %cst_4 : f32 to vector<2x16x20xf32>
    %14 = arith.mulf %13, %12 : vector<2x16x20xf32>
    %15 = arith.addf %11, %14 : vector<2x16x20xf32>
    %16 = vector.extract_strided_slice %0 {offsets = [0, 4, 0], sizes = [2, 16, 20], strides = [1, 1, 1]} : vector<2x20x20xf32> to vector<2x16x20xf32>
    %cst_5 = arith.constant 0.196882486 : f32
    %17 = vector.broadcast %cst_5 : f32 to vector<2x16x20xf32>
    %18 = arith.mulf %17, %16 : vector<2x16x20xf32>
    %19 = arith.addf %15, %18 : vector<2x16x20xf32>
    %20 = vector.extract_strided_slice %19 {offsets = [0, 0, 0], sizes = [2, 16, 16], strides = [1, 1, 1]} : vector<2x16x20xf32> to vector<2x16x16xf32>
    %cst_6 = arith.constant 0.196882486 : f32
    %21 = vector.broadcast %cst_6 : f32 to vector<2x16x16xf32>
    %22 = arith.mulf %21, %20 : vector<2x16x16xf32>
    %23 = vector.extract_strided_slice %19 {offsets = [0, 0, 1], sizes = [2, 16, 16], strides = [1, 1, 1]} : vector<2x16x20xf32> to vector<2x16x16xf32>
    %cst_7 = arith.constant 0.201551422 : f32
    %24 = vector.broadcast %cst_7 : f32 to vector<2x16x16xf32>
    %25 = arith.mulf %24, %23 : vector<2x16x16xf32>
    %26 = arith.addf %22, %25 : vector<2x16x16xf32>
    %27 = vector.extract_strided_slice %19 {offsets = [0, 0, 2], sizes = [2, 16, 16], strides = [1, 1, 1]} : vector<2x16x20xf32> to vector<2x16x16xf32>
    %cst_8 = arith.constant 0.203132197 : f32
    %28 = vector.broadcast %cst_8 : f32 to vector<2x16x16xf32>
    %29 = arith.mulf %28, %27 : vector<2x16x16xf32>
    %30 = arith.addf %26, %29 : vector<2x16x16xf32>
    %31 = vector.extract_strided_slice %19 {offsets = [0, 0, 3], sizes = [2, 16, 16], strides = [1, 1, 1]} : vector<2x16x20xf32> to vector<2x16x16xf32>
    %cst_9 = arith.constant 0.201551422 : f32
    %32 = vector.broadcast %cst_9 : f32 to vector<2x16x16xf32>
    %33 = arith.mulf %32, %31 : vector<2x16x16xf32>
    %34 = arith.addf %30, %33 : vector<2x16x16xf32>
    %35 = vector.extract_strided_slice %19 {offsets = [0, 0, 4], sizes = [2, 16, 16], strides = [1, 1, 1]} : vector<2x16x20xf32> to vector<2x16x16xf32>
    %cst_10 = arith.constant 0.196882486 : f32
    %36 = vector.broadcast %cst_10 : f32 to vector<2x16x16xf32>
    %37 = arith.mulf %36, %35 : vector<2x16x16xf32>
    %38 = arith.addf %34, %37 : vector<2x16x16xf32>
    %c0_11 = arith.constant 0 : index
    %c0_12 = arith.constant 0 : index
    %c0_13 = arith.constant 0 : index
    %39 = vector.load %arg2[%c0_11, %c0_12, %c0_13] : memref<2x16x16xf32, #tpu.memory_space<vmem>>, vector<2x16x16xf32>
    %40 = arith.subf %39, %38 : vector<2x16x16xf32>
    %41 = math.absf %40 : vector<2x16x16xf32>
    %cst_14 = arith.constant dense<0.000000e+00> : vector<2x16xf32>
    %42 = vector.multi_reduction <add>, %41, %cst_14 [2] : vector<2x16x16xf32> to vector<2x16xf32>
    %43 = vector.shape_cast %42 : vector<2x16xf32> to vector<2x16x1xf32>
    %cst_15 = arith.constant dense<0.000000e+00> : vector<2x1xf32>
    %44 = vector.multi_reduction <add>, %43, %cst_15 [1] : vector<2x16x1xf32> to vector<2x1xf32>
    %45 = vector.shape_cast %44 : vector<2x1xf32> to vector<2x1x1xf32>
    %cst_16 = arith.constant dense<0.000000e+00> : vector<1x1xf32>
    %46 = vector.multi_reduction <add>, %45, %cst_16 [0] : vector<2x1x1xf32> to vector<1x1xf32>
    %47 = vector.shape_cast %46 : vector<1x1xf32> to vector<1x1x1xf32>
    %48 = vector.shape_cast %47 : vector<1x1x1xf32> to vector<1x1xf32>
    %49 = vector.shape_cast %48 : vector<1x1xf32> to vector<1x1xf32>
    %50 = vector.broadcast %49 : vector<1x1xf32> to vector<8x128xf32>
    %c0_17 = arith.constant 0 : index
    %c0_18 = arith.constant 0 : index
    %c0_19 = arith.constant 0 : index
    %51 = vector.load %arg3[%c0_17, %c0_18, %c0_19] : memref<1x8x128xf32, #tpu.memory_space<vmem>>, vector<1x8x128xf32>
    %52 = vector.shape_cast %51 : vector<1x8x128xf32> to vector<8x128xf32>
    %53 = vector.shape_cast %50 : vector<8x128xf32> to vector<1x8x128xf32>
    tpu.vector_store %arg3[%c0_17, %c0_18, %c0_19], %53 {strides = array<i32>} : memref<1x8x128xf32, #tpu.memory_space<vmem>>, vector<1x8x128xf32>,
    return
  }
  func.func @transform_0(%arg0: i32) -> (i32, i32, i32) {
    %c0_i32 = arith.constant 0 : i32
    %c0_i32_0 = arith.constant 0 : i32
    %c0_i32_1 = arith.constant 0 : i32
    return %arg0, %c0_i32, %c0_i32_0 : i32, i32, i32
  }
  func.func @transform_1(%arg0: i32) -> (i32, i32, i32) {
    %c0_i32 = arith.constant 0 : i32
    %c0_i32_0 = arith.constant 0 : i32
    %c0_i32_1 = arith.constant 0 : i32
    return %arg0, %c0_i32, %c0_i32_0 : i32, i32, i32
  }
  func.func @transform_2(%arg0: i32) -> (i32, i32, i32) {
    %c0_i32 = arith.constant 0 : i32
    %c0_i32_0 = arith.constant 0 : i32
    %c0_i32_1 = arith.constant 0 : i32
    return %arg0, %c0_i32, %c0_i32_0 : i32, i32, i32
  }
}

</mosaic_0001>

<bundles_post_ra>
// kernel: flow_loss_forward.6
= control target key start
LH: loop header
LB: loop body
LE: loop exit
PB: predicated region body
PF: predicated region fallthrough
CT: control target
= control target key end

     0   :  { %s585_s12 = smov 0   ;;  %s587_s13 = smov 0   ;;  %s631_s0 = inlined_call_operand.vmem [shape: f32[2,1,256], index: 0, kind: input, shape index: {}]   ;;  %s632_s1 = inlined_call_operand.vmem [shape: f32[2,1,256], index: 1, kind: input, shape index: {}]   ;;  %s633_s2 = inlined_call_operand.vmem [shape: f32[2,16,16], index: 2, kind: input, shape index: {}]   ;;  %s634_s3 = inlined_call_operand.vmem [shape: f32[2,1,256], index: 3, kind: output, shape index: {}]  }
   0x1   :  { %s589_s14 = smov 0  }
   0x2 LB: > { %s25_s15 = sadd.s32 1, %s559_s13  ;;  %p500_p0 = scmp.ge.s32.totalorder %s563_s14, 1  ;;  %s563_s14 = sphi %s589_s14, %s13_s14   ;;  %s559_s13 = sphi %s587_s13, %s636_s13   ;;  %s555_s12 = sphi %s585_s12, %s635_s12  }
   0x3   : > { %p27_p1 = scmp.ge.s32.totalorder %s25_s15, 2  ;;  %p183_p2 = scmp.lt.s32.totalorder %s563_s14, 3 }
   0x5   : > { %s638_s15 = smov (%p27_p1, %s25_s15), 0  ;;  %p184_p3 = pnand %p500_p0, %p183_p2 }
   0x6   : > { %p227_p4 = scmp.lt.s32.totalorder (!%p184_p3), %s555_s12, 1 }
   0x7   : > { %187 = sbr.rel (%p184_p3) target bundleno = 183 (0xb7), region = 32 }
   0xc   : > { %v262_v0 = vlaneseq  ;;  %s640_s12 = smov (!%p227_p4, %s555_s12), 1  ;;  %vm309_vm0 = vcmask 130048   ;;  %vm383_vm1 = vcmask 1040384  }
   0xd   : > { %s604_s16 = sshll.u32 %s640_s12, 1  ;;  %s512_s20 = sshll.u32 %s640_s12, 4 }
   0xe   : > { %v263_v1 = vshrl.u32 %v262_v0, 7  ;;  %s233_s19 = scalar_lea.vmem %s631_s0, %s604_s16  ;;  %s248_s23 = scalar_lea.vmem %s633_s2, %s512_s20  ;;  %vm388_vm2 = vcmp.lt.s32.totalorder %v262_v0, 256 }
   0xf   : > { %v258_v4 = vld [vmem:[%s233_s19] sm:$0x3]  ;;  %v261_v24 = vld [vmem:[%s248_s23 + $0x8] sm:$0xff]  ;;  %s242_s26 = scalar_lea.vmem %s632_s1, %s604_s16  ;;  %s256_s29 = scalar_lea.vmem %s634_s3, %s604_s16 }
  0x10   : > { %v264_v2 = vadd.s32 8, %v263_v1  ;;  %v265_v3 = vcvt.s32.f32 %v263_v1  ;;  %v268_v6 = vperm.slane %v258_v4, 0  ;;  %v269_v7 = vperm.slane %v258_v4, 1  ;;  %v260_v25 = vld [vmem:[%s248_s23] sm:$0xff] }
  0x11   : > { %v259_v26 = vld [vmem:[%s242_s26] sm:$0x3] }
  0x12   : > { %v266_v5 = vcvt.s32.f32 %v264_v2  ;;  %v272_v10 = vsub.f32 %v268_v6, %v265_v3  ;;  %v273_v11 = vsub.f32 %v269_v7, %v265_v3  ;;  %v289_v27 = vperm.slane %v259_v26, 0 }
  0x13   : > { %v290_v28 = vperm.slane %v259_v26, 1 }
  0x14   : > { %v274_v8 = vsub.f32 %v268_v6, %v266_v5  ;;  %v275_v9 = vsub.f32 %v269_v7, %v266_v5  ;;  %v276_v14 = vand.u32 2147483647, %v272_v10  ;;  %v277_v15 = vand.u32 2147483647, %v273_v11 }
  0x15   : > { %v293_v29 = vsub.f32 %v289_v27, %v265_v3  ;;  %v294_v30 = vsub.f32 %v290_v28, %v265_v3  ;;  %v295_v31 = vsub.f32 %v289_v27, %v266_v5  ;;  %v296_v32 = vsub.f32 %v290_v28, %v266_v5 }
  0x16   : > { %v278_v12 = vand.u32 2147483647, %v274_v8  ;;  %v279_v13 = vand.u32 2147483647, %v275_v9  ;;  %v280_v18 = vsub.f32 1.0, %v276_v14  ;;  %v281_v19 = vsub.f32 1.0, %v277_v15 }
  0x17   : > { %v297_v33 = vand.u32 2147483647, %v293_v29  ;;  %v298_v34 = vand.u32 2147483647, %v294_v30  ;;  %v299_v35 = vand.u32 2147483647, %v295_v31 }
  0x18   : > { %v282_v16 = vsub.f32 1.0, %v278_v12  ;;  %v283_v17 = vsub.f32 1.0, %v279_v13  ;;  %v284_v22 = vmax.f32 %v280_v18, 0.0  ;;  %v285_v23 = vmax.f32 %v281_v19, 0.0 }
  0x19   : > { %v300_v36 = vand.u32 2147483647, %v296_v32  ;;  %v301_v37 = vsub.f32 1.0, %v297_v33  ;;  %v302_v38 = vsub.f32 1.0, %v298_v34  ;;  %v303_v39 = vsub.f32 1.0, %v299_v35 }
  0x1a   : > { %v286_v20 = vmax.f32 %v282_v16, 0.0  ;;  %v287_v21 = vmax.f32 %v283_v17, 0.0 }
  0x1b   : > { %v304_v40 = vsub.f32 1.0, %v300_v36  ;;  %v305_v41 = vmax.f32 %v301_v37, 0.0  ;;  %v306_v42 = vmax.f32 %v302_v38, 0.0  ;;  %v307_v45 = vmax.f32 %v303_v39, 0.0 }
  0x1c   : > { %513 = vmatpush.msra.mxu2 %v286_v20  ;;  %515 = vmatpush.msra.mxu3 %v287_v21 }
  0x1d   : > { %330 = vmatpush.msra.mxu0 %v286_v20  ;;  %353 = vmatpush.msra.mxu1 %v287_v21  ;;  %v308_v46 = vmax.f32 %v304_v40, 0.0 }
  0x1e   : > { %514 = vmatpush.msra.mxu2 %v284_v22  ;;  %516 = vmatpush.msra.mxu3 %v285_v23 }
  0x1f   : > { %507 = vmatmul.msk.f32.vlgmr.msra.gmra.mxu2 %vm309_vm0, %v261_v24  ;;  %509 = vmatmul.msk.f32.vlgmr.msra.gmra.mxu3 %vm309_vm0, %v261_v24 }
  0x20   : > { %331 = vmatpush.msra.mxu0 %v284_v22  ;;  %354 = vmatpush.msra.mxu1 %v285_v23 }
  0x21   : > { %506 = vmatmul.msk.f32.vlgmr.msra.gmra.mxu0 %vm309_vm0, %v260_v25  ;;  %508 = vmatmul.msk.f32.vlgmr.msra.gmra.mxu1 %vm309_vm0, %v260_v25 }
  0x9e   : > { %v333_v43 = vpop.f32.mrf.mxu0  ;;  %v356_v44 = vpop.f32.mrf.mxu1 }
  0x9f   : > { %v362_v47 = vmul.f32 %v333_v43, %v305_v41  ;;  %v363_v48 = vmul.f32 %v356_v44, %v306_v42 }
  0xa2   : > { %v336_v49 = vpop.f32.mrf.mxu2  ;;  %v359_v50 = vpop.f32.mrf.mxu3 }
  0xa3   : > { %v364_v51 = vmul.f32 %v336_v49, %v307_v45  ;;  %v365_v52 = vmul.f32 %v359_v50, %v308_v46 }
  0xa5   : > { %v366_v53 = vadd.f32 %v364_v51, %v362_v47  ;;  %v373_v54 = vadd.f32 %v365_v52, %v363_v48 }
  0xa7   : > { %v367_v55 = vrot.slane %v366_v53, 4  ;;  %v374_v56 = vrot.slane %v373_v54, 4 }
  0xa9   : > { %v368_v57 = vadd.f32 %v367_v55, %v366_v53  ;;  %v375_v58 = vadd.f32 %v374_v56, %v373_v54 }
  0xab   : > { %v369_v59 = vrot.slane %v368_v57, 2  ;;  %v376_v60 = vrot.slane %v375_v58, 2 }
  0xad   : > { %v370_v61 = vadd.f32 %v369_v59, %v368_v57  ;;  %v377_v62 = vadd.f32 %v376_v60, %v375_v58 }
  0xaf   : > { %v371_v63 = vrot.slane %v370_v61, 1  ;;  %v378_v1 = vrot.slane %v377_v62, 1 }
  0xb1   : > { %v379_v2 = vadd.f32 %v378_v1, %v377_v62  ;;  %v372_v3 = vadd.f32 %v371_v63, %v370_v61 }
  0xb3   : > { %v382_v4 = vrot.slane %v379_v2, 7 }
  0xb5   : > { %v384_v5 = vsel %vm383_vm1, %v372_v3, %v382_v4 }
  0xb6   : > { %390 = vst.msk [vmem:[%s256_s29] sm:$0x3] %vm388_vm2, %v384_v5 }
  0xb7 PF: > { %s13_s14 = sadd.s32 1, %s563_s14   ;;  %s635_s12 = smov %s559_s13 }
  0xb8   : > { %p10_p5 = scmp.ge.s32.totalorder %s13_s14, 4   ;;  %s636_s13 = smov %s638_s15 }
  0xba   :  { %12 = sbr.rel (!%p10_p5) target bundleno = 2 (0x2), region = 68 }

// kernel: flow_loss_forward.5
= control target key start
LH: loop header
LB: loop body
LE: loop exit
PB: predicated region body
PF: predicated region fallthrough
CT: control target
= control target key end

     0   :  { %s564_s12 = smov 0   ;;  %s566_s13 = smov 0   ;;  %s614_s0 = inlined_call_operand.vmem [shape: f32[2,2,16,16], index: 0, kind: input, shape index: {}]   ;;  %s615_s1 = inlined_call_operand.vmem [shape: f32[2,2,16,16], index: 1, kind: input, shape index: {}]   ;;  %s616_s2 = inlined_call_operand.vmem [shape: f32[2,16,16], index: 2, kind: input, shape index: {}]   ;;  %s617_s3 = inlined_call_operand.vmem [shape: f32[2,1,8,128], index: 3, kind: output, shape index: {}]  }
   0x1   :  { %s568_s14 = smov 0  }
   0x2 LB: > { %s25_s15 = sadd.s32 1, %s537_s13  ;;  %p475_p0 = scmp.ge.s32.totalorder %s541_s14, 1  ;;  %s541_s14 = sphi %s568_s14, %s13_s14   ;;  %s537_s13 = sphi %s566_s13, %s619_s13   ;;  %s533_s12 = sphi %s564_s12, %s618_s12  }
   0x3   : > { %p27_p1 = scmp.ge.s32.totalorder %s25_s15, 2  ;;  %p192_p2 = scmp.lt.s32.totalorder %s541_s14, 3 }
   0x5   : > { %s621_s15 = smov (%p27_p1, %s25_s15), 0  ;;  %p193_p3 = pnand %p475_p0, %p192_p2 }
   0x6   : > { %p241_p4 = scmp.lt.s32.totalorder (!%p193_p3), %s533_s12, 1 }
   0x7   : > { %196 = sbr.rel (%p193_p3) target bundleno = 169 (0xa9), region = 32 }
   0xc   : > { %s623_s12 = smov (!%p241_p4, %s533_s12), 1  ;;  %vm288_vm0 = vcmask 130048   ;;  %v543_v2 = vmov 0.0   ;;  %v285_v46 = vlaneseq }
   0xd   : > { %s493_s16 = sshll.u32 %s623_s12, 4  ;;  %s491_s20 = sshll.u32 %s623_s12, 5 }
   0xe   : > { %s268_s19 = scalar_lea.vmem %s616_s2, %s493_s16  ;;  %s248_s23 = scalar_lea.vmem %s614_s0, %s491_s20  ;;  %v286_v52 = vand.u32 127, %v285_v46 }
   0xf   : > { %v277_v0 = vld [vmem:[%s268_s19] sm:$0xff]  ;;  %v278_v1 = vld [vmem:[%s268_s19 + $0x8] sm:$0xff]  ;;  %s258_s26 = scalar_lea.vmem %s615_s1, %s491_s20  ;;  %v485_v4 = vld [vmem:[%s248_s23 + $0x10] sm:$0xff]  ;;  %s482_s27 = sshll.u32 %s623_s12, 3 }
  0x10   : > { %vm279_vm1 = vcmp.gt.f32.partialorder %v277_v0, 0.0  ;;  %v487_v5 = vld [vmem:[%s258_s26 + $0x10] sm:$0xff]  ;;  %v303_v6 = vld [vmem:[%s248_s23] sm:$0xff]  ;;  %vm280_vm2 = vcmp.gt.f32.partialorder %v278_v1, 0.0  ;;  %v486_v10 = vld [vmem:[%s248_s23 + $0x18] sm:$0xff]  ;;  %vm287_vm3 = vcmp.eq.s32.totalorder %v286_v52, 2  ;;  %s276_s30 = scalar_lea.vmem %s617_s3, %s482_s27 }
  0x11   : > { %v483_v3 = vsel %vm279_vm1, 1.0, %v543_v2  ;;  %v335_v8 = vsub.f32 %v485_v4, %v487_v5  ;;  %v305_v9 = vld [vmem:[%s258_s26] sm:$0xff]  ;;  %v488_v11 = vld [vmem:[%s258_s26 + $0x18] sm:$0xff]  ;;  %v304_v14 = vld [vmem:[%s248_s23 + $0x8] sm:$0xff]  ;;  %v484_v19 = vsel %vm280_vm2, 1.0, %v543_v2  ;;  %vm326_vm4 = vcmp.eq.s32.totalorder %v286_v52, 0 }
  0x12   : > { %v289_v7 = vsel %vm288_vm0, %v483_v3, 0.0  ;;  %v307_v12 = vsub.f32 %v303_v6, %v305_v9  ;;  %v336_v13 = vsub.f32 %v486_v10, %v488_v11  ;;  %v306_v15 = vld [vmem:[%s258_s26 + $0x8] sm:$0xff]  ;;  %v292_v25 = vsel %vm288_vm0, %v484_v19, 0.0 }
  0x13   : > { %290 = vadd.xlane.f32.xlu0 %v289_v7  ;;  %v337_v16 = vand.u32 2147483647, %v335_v8  ;;  %v308_v17 = vsub.f32 %v304_v14, %v306_v15  ;;  %vm354_vm5 = vcmp.eq.s32.totalorder %v286_v52, 1 }
  0x14   : > { %v309_v18 = vand.u32 2147483647, %v307_v12  ;;  %v338_v21 = vand.u32 2147483647, %v336_v13 }
  0x15   : > { %v339_v20 = vmul.f32 %v483_v3, %v337_v16  ;;  %v310_v23 = vand.u32 2147483647, %v308_v17 }
  0x16   : > { %v311_v22 = vmul.f32 %v483_v3, %v309_v18  ;;  %v340_v27 = vmul.f32 %v484_v19, %v338_v21 }
  0x17   : > { %v341_v24 = vsel %vm288_vm0, %v339_v20, 0.0  ;;  %v312_v28 = vmul.f32 %v484_v19, %v310_v23 }
  0x18   : > { %342 = vadd.xlane.f32.xlu2 %v341_v24  ;;  %v313_v26 = vsel %vm288_vm0, %v311_v22, 0.0  ;;  %v344_v29 = vsel %vm288_vm0, %v340_v27, 0.0 }
  0x19   : > { %314 = vadd.xlane.f32.xlu1 %v313_v26  ;;  %v316_v30 = vsel %vm288_vm0, %v312_v28, 0.0 }
  0x1b   : > { %293 = vadd.xlane.f32.xlu0 %v292_v25 }
  0x20   : > { %345 = vadd.xlane.f32.xlu2 %v344_v29 }
  0x21   : > { %317 = vadd.xlane.f32.xlu1 %v316_v30 }
  0x86   : > { %v291_v31 = vpop.xlane.xlu0 %290 }
  0x8b   : > { %v343_v32 = vpop.xlane.xlu2 %342 }
  0x8c   : > { %v315_v33 = vpop.xlane.xlu1 %314 }
  0x8e   : > { %v294_v34 = vpop.xlane.xlu0 %293 }
  0x8f   : > { %v295_v35 = vadd.f32 %v294_v34, %v291_v31 }
  0x91   : > { %v296_v36 = vrot.slane %v295_v35, 4 }
  0x93   : > { %v297_v37 = vadd.f32 %v296_v36, %v295_v35  ;;  %v346_v38 = vpop.xlane.xlu2 %345 }
  0x94   : > { %v347_v40 = vadd.f32 %v346_v38, %v343_v32  ;;  %v318_v41 = vpop.xlane.xlu1 %317 }
  0x95   : > { %v298_v39 = vrot.slane %v297_v37, 2  ;;  %v319_v42 = vadd.f32 %v318_v41, %v315_v33 }
  0x96   : > { %v348_v43 = vrot.slane %v347_v40, 4 }
  0x97   : > { %v299_v44 = vadd.f32 %v298_v39, %v297_v37  ;;  %v320_v45 = vrot.slane %v319_v42, 4 }
  0x98   : > { %v349_v47 = vadd.f32 %v348_v43, %v347_v40 }
  0x99   : > { %v321_v48 = vadd.f32 %v320_v45, %v319_v42  ;;  %v300_v50 = vrot.slane %v299_v44, 1 }
  0x9a   : > { %v350_v49 = vrot.slane %v349_v47, 2 }
  0x9b   : > { %v322_v51 = vrot.slane %v321_v48, 2  ;;  %v301_v56 = vadd.f32 %v300_v50, %v299_v44 }
  0x9c   : > { %v351_v53 = vadd.f32 %v350_v49, %v349_v47 }
  0x9d   : > { %v323_v54 = vadd.f32 %v322_v51, %v321_v48  ;;  %v302_v60 = vsel %vm287_vm3, %v301_v56, 0.0 }
  0x9e   : > { %v352_v55 = vrot.slane %v351_v53, 1 }
  0x9f   : > { %v324_v57 = vrot.slane %v323_v54, 1 }
  0xa0   : > { %v353_v58 = vadd.f32 %v352_v55, %v351_v53 }
  0xa1   : > { %v325_v59 = vadd.f32 %v324_v57, %v323_v54 }
  0xa2   : > { %v355_v63 = vsel %vm354_vm5, %v353_v58, 0.0 }
  0xa3   : > { %v327_v61 = vsel %vm326_vm4, %v325_v59, 0.0 }
  0xa4   : > { %v328_v62 = vadd.f32 %v327_v61, %v302_v60 }
  0xa6   : > { %v356_v0 = vadd.f32 %v355_v63, %v328_v62 }
  0xa8   : > { %357 = vst [vmem:[%s276_s30] sm:$0xff] %v356_v0 }
  0xa9 PF: > { %s13_s14 = sadd.s32 1, %s541_s14   ;;  %s618_s12 = smov %s537_s13 }
  0xaa   : > { %p10_p5 = scmp.ge.s32.totalorder %s13_s14, 4   ;;  %s619_s13 = smov %s621_s15 }
  0xac   :  { %12 = sbr.rel (!%p10_p5) target bundleno = 2 (0x2), region = 70 }

// kernel: flow_loss_forward.8
= control target key start
LH: loop header
LB: loop body
LE: loop exit
PB: predicated region body
PF: predicated region fallthrough
CT: control target
= control target key end

     0   :  { %s442_s6 = smov 0   ;;  %s495_s0 = inlined_call_operand.vmem [shape: f32[4,20,20], index: 0, kind: input, shape index: {}]   ;;  %s496_s1 = inlined_call_operand.vmem [shape: f32[4,16,16], index: 1, kind: output, shape index: {}]  }
   0x1 LB: > { %s394_s7 = sadd.s32 4294967295, %s426_s6   ;;  %p398_p0 = scmp.ge.s32.totalorder %s426_s6, 1  ;;  %s426_s6 = sphi %s442_s6, %s11_s6  }
   0x2   : > { %p89_p1 = scmp.lt.s32.totalorder %s426_s6, 3 }
   0x4   : > { %p90_p2 = pnand %p398_p0, %p89_p1 }
   0x5   : > { %s399_s8 = sshll.u32 (!%p90_p2), %s394_s7, 1  ;;  %s428_s13 = smov (!%p90_p2), 127  }
   0x6   : > { %93 = sbr.rel (%p90_p2) target bundleno = 194 (0xc2), region = 24  ;;  %p112_p3 = scmp.lt.s32.totalorder (!%p90_p2), %s399_s8, 3 }
   0x7   : > { %s429_s14 = smov (!%p90_p2), 126   ;;  %s430_s15 = smov (!%p90_p2), 125  }
   0x8   : > { %s431_s16 = smov (!%p90_p2), 124  }
   0xb   : > { %s498_s8 = smov (!%p112_p3, %s399_s8), 3  ;;  %vm147_vm0 = vcmask 1046528   ;;  %vm178_vm1 = vcmask 1045504   ;;  %vm224_vm2 = vcmask 1043456   ;;  %vm197_vm3 = vcmask 1044480  }
   0xc   : > { %s407_s9 = smul.u32 24, %s498_s8  ;;  %s406_s17 = sshll.u32 %s498_s8, 4  ;;  %vm331_vm4 = vcmask 130048  }
   0xd   : > { %s123_s20 = scalar_lea.vmem %s496_s1, %s406_s17 }
   0xe   : > { %s456_s12 = scalar_lea.vmem %s495_s0, %s407_s9 }
   0xf   : > { %v128_v0 = vld [vmem:[%s456_s12 + $0x18] sm:$0xff]  ;;  %v129_v1 = vld [vmem:[%s456_s12 + $0x20] sm:$0xff]  ;;  %v126_v13 = vld [vmem:[%s456_s12 + $0x8] sm:$0xff] }
  0x10   : > { %v125_v2 = vld [vmem:[%s456_s12] sm:$0xff]  ;;  %v133_v3 = vmul.f32 0.19688249, %v128_v0  ;;  %v461_v4 = vmul.f32 0.19688249, %v129_v1 }
  0x11   : > { %v138_v5 = vmul.f32 0.20155142, %v128_v0  ;;  %v139_v6 = vmul.f32 0.20155142, %v129_v1  ;;  %v169_v7 = vmul.f32 0.2031322, %v128_v0 }
  0x12   : > { %v170_v8 = vmul.f32 0.2031322, %v129_v1  ;;  %v230_v11 = vrot.slane %v133_v3, 4  ;;  %v231_v12 = vrot.slane %v461_v4, 4  ;;  %v131_v19 = vmul.f32 0.19688249, %v125_v2 }
  0x13   : > { %v153_v9 = vrot.slane %v138_v5, 1  ;;  %v203_v10 = vrot.slane %v138_v5, 3  ;;  %v154_v14 = vrot.slane %v139_v6, 1  ;;  %v184_v15 = vrot.slane %v169_v7, 2  ;;  %v130_v25 = vld [vmem:[%s456_s12 + $0x28] sm:$0xf] }
  0x14   : > { %v185_v16 = vrot.slane %v170_v8, 2  ;;  %v204_v17 = vrot.slane %v139_v6, 3  ;;  %v232_v18 = vsel %vm224_vm2, %v230_v11, %v231_v12  ;;  %v135_v20 = vmul.f32 0.20155142, %v125_v2  ;;  %v127_v38 = vld [vmem:[%s456_s12 + $0x10] sm:$0xf] }
  0x15   : > { %v155_v21 = vsel %vm147_vm0, %v153_v9, %v154_v14  ;;  %v132_v23 = vmul.f32 0.19688249, %v126_v13  ;;  %v136_v24 = vmul.f32 0.20155142, %v126_v13  ;;  %v166_v28 = vmul.f32 0.2031322, %v125_v2 }
  0x16   : > { %v186_v22 = vsel %vm178_vm1, %v184_v15, %v185_v16  ;;  %v164_v26 = vadd.f32 %v155_v21, %v133_v3  ;;  %v148_v27 = vrot.slane %v135_v20, 1  ;;  %v167_v29 = vmul.f32 0.2031322, %v126_v13 }
  0x17   : > { %v205_v30 = vsel %vm197_vm3, %v203_v10, %v204_v17  ;;  %v149_v31 = vrot.slane %v136_v24, 1  ;;  %v198_v32 = vrot.slane %v135_v20, 3  ;;  %v199_v33 = vrot.slane %v136_v24, 3 }
  0x18   : > { %v195_v34 = vadd.f32 %v186_v22, %v164_v26  ;;  %v179_v35 = vrot.slane %v166_v28, 2  ;;  %v180_v36 = vrot.slane %v167_v29, 2  ;;  %v225_v37 = vrot.slane %v131_v19, 4 }
  0x19   : > { %v150_v39 = vsel %vm147_vm0, %v148_v27, %v149_v31  ;;  %v226_v40 = vrot.slane %v132_v23, 4  ;;  %v140_v41 = vmul.f32 0.20155142, %v130_v25  ;;  %v171_v42 = vmul.f32 0.2031322, %v130_v25 }
  0x1a   : > { %v214_v43 = vadd.f32 %v205_v30, %v195_v34  ;;  %v162_v44 = vadd.f32 %v150_v39, %v131_v19  ;;  %v181_v45 = vsel %vm178_vm1, %v179_v35, %v180_v36  ;;  %v200_v46 = vsel %vm197_vm3, %v198_v32, %v199_v33 }
  0x1b   : > { %v156_v47 = vrot.slane %v140_v41, 1  ;;  %v187_v48 = vrot.slane %v171_v42, 2  ;;  %v206_v49 = vrot.slane %v140_v41, 3  ;;  %v217_v50 = vmul.f32 0.19688249, %v130_v25 }
  0x1c   : > { %v241_v51 = vadd.f32 %v232_v18, %v214_v43  ;;  %v193_v52 = vadd.f32 %v181_v45, %v162_v44  ;;  %v137_v53 = vmul.f32 0.20155142, %v127_v38  ;;  %v168_v54 = vmul.f32 0.2031322, %v127_v38 }
  0x1d   : > { %v227_v55 = vsel %vm224_vm2, %v225_v37, %v226_v40  ;;  %v157_v56 = vsel %vm147_vm0, %v154_v14, %v156_v47  ;;  %v188_v57 = vsel %vm178_vm1, %v185_v16, %v187_v48  ;;  %v233_v58 = vrot.slane %v217_v50, 4 }
  0x1e   : > { %v249_v59 = vmul.f32 0.20155142, %v241_v51  ;;  %v212_v60 = vadd.f32 %v200_v46, %v193_v52  ;;  %v165_v61 = vadd.f32 %v157_v56, %v461_v4  ;;  %v151_v62 = vrot.slane %v137_v53, 1 }
  0x1f   : > { %v207_v63 = vsel %vm197_vm3, %v204_v17, %v206_v49  ;;  %v182_v0 = vrot.slane %v168_v54, 2  ;;  %v201_v1 = vrot.slane %v137_v53, 3  ;;  %v216_v2 = vmul.f32 0.19688249, %v127_v38 }
  0x20   : > { %259 = vrot.lane.b32.xlu1 %v249_v59, %s428_s13  ;;  %v239_v3 = vadd.f32 %v227_v55, %v212_v60  ;;  %v196_v5 = vadd.f32 %v188_v57, %v165_v61  ;;  %v152_v6 = vsel %vm147_vm0, %v149_v31, %v151_v62  ;;  %v234_v7 = vsel %vm224_vm2, %v231_v12, %v233_v58 }
  0x21   : > { %v163_v8 = vadd.f32 %v152_v6, %v132_v23  ;;  %v183_v9 = vsel %vm178_vm1, %v180_v36, %v182_v0  ;;  %v228_v10 = vrot.slane %v216_v2, 4  ;;  %v202_v13 = vsel %vm197_vm3, %v199_v33, %v201_v1 }
  0x22   : > { %v247_v11 = vmul.f32 0.20155142, %v239_v3  ;;  %v215_v4 = vadd.f32 %v207_v63, %v196_v5  ;;  %v271_v14 = vmul.f32 0.2031322, %v239_v3  ;;  %v273_v23 = vmul.f32 0.2031322, %v241_v51 }
  0x23   : > { %v194_v15 = vadd.f32 %v183_v9, %v163_v8  ;;  %v229_v17 = vsel %vm224_vm2, %v226_v40, %v228_v10  ;;  %v243_v25 = vmul.f32 0.19688249, %v239_v3  ;;  %v245_v26 = vmul.f32 0.19688249, %v241_v51 }
  0x24   : > { %255 = vrot.lane.b32.xlu0 %v247_v11, %s428_s13  ;;  %v242_v16 = vadd.f32 %v234_v7, %v215_v4  ;;  %279 = vrot.lane.b32.xlu2 %v271_v14, %s429_s14 }
  0x25   : > { %v213_v18 = vadd.f32 %v202_v13, %v194_v15 }
  0x26   : > { %v250_v19 = vmul.f32 0.20155142, %v242_v16  ;;  %v274_v22 = vmul.f32 0.2031322, %v242_v16  ;;  %v246_v27 = vmul.f32 0.19688249, %v242_v16 }
  0x27   : > { %v240_v20 = vadd.f32 %v229_v17, %v213_v18 }
  0x28   : > { %261 = vrot.lane.b32.xlu1 %v250_v19, %s428_s13 }
  0x29   : > { %v248_v12 = vmul.f32 0.20155142, %v240_v20  ;;  %v272_v21 = vmul.f32 0.2031322, %v240_v20  ;;  %v244_v24 = vmul.f32 0.19688249, %v240_v20 }
  0x2c   : > { %257 = vrot.lane.b32.xlu0 %v248_v12, %s428_s13  ;;  %281 = vrot.lane.b32.xlu2 %v272_v21, %s429_s14 }
  0x30   : > { %285 = vrot.lane.b32.xlu1 %v274_v22, %s429_s14 }
  0x34   : > { %283 = vrot.lane.b32.xlu0 %v273_v23, %s429_s14  ;;  %295 = vrot.lane.b32.xlu2 %v247_v11, %s430_s15 }
  0x38   : > { %299 = vrot.lane.b32.xlu1 %v249_v59, %s430_s15 }
  0x3c   : > { %297 = vrot.lane.b32.xlu0 %v248_v12, %s430_s15  ;;  %301 = vrot.lane.b32.xlu2 %v250_v19, %s430_s15 }
  0x40   : > { %317 = vrot.lane.b32.xlu1 %v244_v24, %s431_s16 }
  0x44   : > { %315 = vrot.lane.b32.xlu0 %v243_v25, %s431_s16  ;;  %319 = vrot.lane.b32.xlu2 %v245_v26, %s431_s16 }
  0x4c   : > { %321 = vrot.lane.b32.xlu0 %v246_v27, %s431_s16 }
  0x7e   : > { %v280_v28 = vpop.permute.xlu2 %279 }
  0x86   : > { %v282_v31 = vpop.permute.xlu2 %281 }
  0x8e   : > { %v296_v35 = vpop.permute.xlu2 %295 }
  0x92   : > { %v260_v29 = vpop.permute.xlu1 %259 }
  0x93   : > { %v269_v43 = vadd.f32 %v260_v29, %v245_v26 }
  0x96   : > { %v256_v30 = vpop.permute.xlu0 %255  ;;  %v302_v39 = vpop.permute.xlu2 %301 }
  0x97   : > { %v267_v40 = vadd.f32 %v256_v30, %v243_v25 }
  0x99   : > { %v291_v44 = vadd.f32 %v280_v28, %v267_v40 }
  0x9a   : > { %v262_v32 = vpop.permute.xlu1 %261 }
  0x9b   : > { %v307_v50 = vadd.f32 %v296_v35, %v291_v44  ;;  %v270_v51 = vadd.f32 %v262_v32, %v246_v27 }
  0x9e   : > { %v258_v33 = vpop.permute.xlu0 %257  ;;  %v320_v52 = vpop.permute.xlu2 %319 }
  0x9f   : > { %v268_v38 = vadd.f32 %v258_v33, %v244_v24 }
  0xa1   : > { %v292_v42 = vadd.f32 %v282_v31, %v268_v38 }
  0xa2   : > { %v286_v34 = vpop.permute.xlu1 %285 }
  0xa3   : > { %v294_v56 = vadd.f32 %v286_v34, %v270_v51 }
  0xa5   : > { %v310_v57 = vadd.f32 %v302_v39, %v294_v56 }
  0xa6   : > { %v284_v36 = vpop.permute.xlu0 %283 }
  0xa7   : > { %v293_v46 = vadd.f32 %v284_v36, %v269_v43 }
  0xaa   : > { %v300_v37 = vpop.permute.xlu1 %299 }
  0xab   : > { %v309_v49 = vadd.f32 %v300_v37, %v293_v46 }
  0xad   : > { %v329_v55 = vadd.f32 %v320_v52, %v309_v49 }
  0xae   : > { %v298_v41 = vpop.permute.xlu0 %297 }
  0xaf   : > { %v308_v45 = vadd.f32 %v298_v41, %v292_v42  ;;  %334 = vst.msk [vmem:[%s123_s20 + $0x10] sm:$0xff] %vm331_vm4, %v329_v55 }
  0xb2   : > { %v318_v47 = vpop.permute.xlu1 %317 }
  0xb3   : > { %v328_v48 = vadd.f32 %v318_v47, %v308_v45 }
  0xb5   : > { %333 = vst.msk [vmem:[%s123_s20 + $0x8] sm:$0xff] %vm331_vm4, %v328_v48 }
  0xb6   : > { %v316_v53 = vpop.permute.xlu0 %315 }
  0xb7   : > { %v327_v54 = vadd.f32 %v316_v53, %v307_v50 }
  0xb9   : > { %332 = vst.msk [vmem:[%s123_s20] sm:$0xff] %vm331_vm4, %v327_v54 }
  0xbe   : > { %v322_v58 = vpop.permute.xlu0 %321 }
  0xbf   : > { %v330_v59 = vadd.f32 %v322_v58, %v310_v57 }
  0xc1   : > { %335 = vst.msk [vmem:[%s123_s20 + $0x18] sm:$0xff] %vm331_vm4, %v330_v59 }
  0xc2 PF: > { %s11_s6 = sadd.s32 1, %s426_s6  }
  0xc3   : > { %p8_p4 = scmp.ge.s32.totalorder %s11_s6, 4  }
  0xc5   :  { %10 = sbr.rel (!%p8_p4) target bundleno = 1 (0x1), region = 54 }

// kernel: flow_loss_forward.9
= control target key start
LH: loop header
LB: loop body
LE: loop exit
PB: predicated region body
PF: predicated region fallthrough
CT: control target
= control target key end

     0   :  { %s538_s9 = smov 0   ;;  %s605_s0 = inlined_call_operand.vmem [shape: f32[4,20,20], index: 0, kind: input, shape index: {}]   ;;  %s606_s1 = inlined_call_operand.vmem [shape: f32[4,16,16], index: 1, kind: input, shape index: {}]   ;;  %s607_s2 = inlined_call_operand.vmem [shape: f32[2,8,128], index: 2, kind: output, shape index: {}]  }
   0x1 LB: > { %s544_s10 = sadd.s32 4294967295, %s517_s9   ;;  %p488_p0 = scmp.ge.s32.totalorder %s517_s9, 1  ;;  %s517_s9 = sphi %s538_s9, %s12_s9  }
   0x2   : > { %p126_p1 = scmp.lt.s32.totalorder %s517_s9, 3 }
   0x4   : > { %p127_p2 = pnand %p488_p0, %p126_p1 }
   0x5   : > { %s489_s11 = sshll.u32 (!%p127_p2), %s544_s10, 1  ;;  %s519_s16 = smov (!%p127_p2), 127  }
   0x6   : > { %130 = sbr.rel (%p127_p2) target bundleno = 331 (0x14b), region = 28  ;;  %p155_p3 = scmp.lt.s32.totalorder (!%p127_p2), %s489_s11, 3 }
   0x7   : > { %s520_s17 = smov (!%p127_p2), 126   ;;  %s521_s18 = smov (!%p127_p2), 125  }
   0x8   : > { %s522_s19 = smov (!%p127_p2), 124   ;;  %p168_p4 = scmp.lt.s32.totalorder (!%p127_p2), %s544_s10, 1 }
   0xb   : > { %s609_s11 = smov (!%p155_p3, %s489_s11), 3  ;;  %vm194_vm0 = vcmask 1046528   ;;  %vm225_vm1 = vcmask 1045504   ;;  %vm271_vm2 = vcmask 1043456   ;;  %vm244_vm3 = vcmask 1044480   ;;  %s611_s10 = smov (!%p168_p4, %s544_s10), 1 }
   0xc   : > { %s498_s12 = smul.u32 24, %s609_s11  ;;  %s497_s20 = sshll.u32 %s609_s11, 4  ;;  %vm390_vm4 = vcmask 130048  }
   0xd   : > { %s587_s23 = scalar_lea.vmem %s606_s1, %s497_s20  ;;  %s494_s24 = sshll.u32 %s611_s10, 3 }
   0xe   : > { %s555_s15 = scalar_lea.vmem %s605_s0, %s498_s12  ;;  %s171_s27 = scalar_lea.vmem %s607_s2, %s494_s24 }
   0xf   : > { %v175_v0 = vld [vmem:[%s555_s15 + $0x18] sm:$0xff]  ;;  %v176_v1 = vld [vmem:[%s555_s15 + $0x20] sm:$0xff]  ;;  %v173_v13 = vld [vmem:[%s555_s15 + $0x8] sm:$0xff] }
  0x10   : > { %v172_v2 = vld [vmem:[%s555_s15] sm:$0xff]  ;;  %v180_v3 = vmul.f32 0.19688249, %v175_v0  ;;  %v560_v4 = vmul.f32 0.19688249, %v176_v1 }
  0x11   : > { %v185_v5 = vmul.f32 0.20155142, %v175_v0  ;;  %v186_v6 = vmul.f32 0.20155142, %v176_v1  ;;  %v216_v7 = vmul.f32 0.2031322, %v175_v0 }
  0x12   : > { %v217_v8 = vmul.f32 0.2031322, %v176_v1  ;;  %v277_v11 = vrot.slane %v180_v3, 4  ;;  %v278_v12 = vrot.slane %v560_v4, 4  ;;  %v178_v19 = vmul.f32 0.19688249, %v172_v2 }
  0x13   : > { %v200_v9 = vrot.slane %v185_v5, 1  ;;  %v250_v10 = vrot.slane %v185_v5, 3  ;;  %v201_v14 = vrot.slane %v186_v6, 1  ;;  %v231_v15 = vrot.slane %v216_v7, 2  ;;  %v177_v25 = vld [vmem:[%s555_s15 + $0x28] sm:$0xf] }
  0x14   : > { %v232_v16 = vrot.slane %v217_v8, 2  ;;  %v251_v17 = vrot.slane %v186_v6, 3  ;;  %v279_v18 = vsel %vm271_vm2, %v277_v11, %v278_v12  ;;  %v182_v20 = vmul.f32 0.20155142, %v172_v2  ;;  %v174_v38 = vld [vmem:[%s555_s15 + $0x10] sm:$0xf] }
  0x15   : > { %v202_v21 = vsel %vm194_vm0, %v200_v9, %v201_v14  ;;  %v179_v23 = vmul.f32 0.19688249, %v173_v13  ;;  %v183_v24 = vmul.f32 0.20155142, %v173_v13  ;;  %v213_v28 = vmul.f32 0.2031322, %v172_v2 }
  0x16   : > { %v233_v22 = vsel %vm225_vm1, %v231_v15, %v232_v16  ;;  %v211_v26 = vadd.f32 %v202_v21, %v180_v3  ;;  %v195_v27 = vrot.slane %v182_v20, 1  ;;  %v214_v29 = vmul.f32 0.2031322, %v173_v13 }
  0x17   : > { %v252_v30 = vsel %vm244_vm3, %v250_v10, %v251_v17  ;;  %v196_v31 = vrot.slane %v183_v24, 1  ;;  %v245_v32 = vrot.slane %v182_v20, 3  ;;  %v246_v33 = vrot.slane %v183_v24, 3 }
  0x18   : > { %v242_v34 = vadd.f32 %v233_v22, %v211_v26  ;;  %v226_v35 = vrot.slane %v213_v28, 2  ;;  %v227_v36 = vrot.slane %v214_v29, 2  ;;  %v272_v37 = vrot.slane %v178_v19, 4 }
  0x19   : > { %v197_v39 = vsel %vm194_vm0, %v195_v27, %v196_v31  ;;  %v273_v40 = vrot.slane %v179_v23, 4  ;;  %v187_v41 = vmul.f32 0.20155142, %v177_v25  ;;  %v218_v42 = vmul.f32 0.2031322, %v177_v25 }
  0x1a   : > { %v261_v43 = vadd.f32 %v252_v30, %v242_v34  ;;  %v209_v44 = vadd.f32 %v197_v39, %v178_v19  ;;  %v228_v45 = vsel %vm225_vm1, %v226_v35, %v227_v36  ;;  %v247_v46 = vsel %vm244_vm3, %v245_v32, %v246_v33 }
  0x1b   : > { %v203_v47 = vrot.slane %v187_v41, 1  ;;  %v234_v48 = vrot.slane %v218_v42, 2  ;;  %v253_v49 = vrot.slane %v187_v41, 3  ;;  %v264_v50 = vmul.f32 0.19688249, %v177_v25 }
  0x1c   : > { %v288_v51 = vadd.f32 %v279_v18, %v261_v43  ;;  %v240_v52 = vadd.f32 %v228_v45, %v209_v44  ;;  %v184_v53 = vmul.f32 0.20155142, %v174_v38  ;;  %v215_v54 = vmul.f32 0.2031322, %v174_v38  ;;  %v380_v44 = vld [vmem:[%s587_s23 + $0x10] sm:$0xff] }
  0x1d   : > { %v274_v55 = vsel %vm271_vm2, %v272_v37, %v273_v40  ;;  %v204_v56 = vsel %vm194_vm0, %v201_v14, %v203_v47  ;;  %v235_v57 = vsel %vm225_vm1, %v232_v16, %v234_v48  ;;  %v280_v58 = vrot.slane %v264_v50, 4 }
  0x1e   : > { %v296_v59 = vmul.f32 0.20155142, %v288_v51  ;;  %v259_v60 = vadd.f32 %v247_v46, %v240_v52  ;;  %v212_v61 = vadd.f32 %v204_v56, %v560_v4  ;;  %v198_v62 = vrot.slane %v184_v53, 1 }
  0x1f   : > { %v254_v63 = vsel %vm244_vm3, %v251_v17, %v253_v49  ;;  %v229_v0 = vrot.slane %v215_v54, 2  ;;  %v248_v1 = vrot.slane %v184_v53, 3  ;;  %v263_v2 = vmul.f32 0.19688249, %v174_v38  ;;  %v379_v53 = vld [vmem:[%s587_s23 + $0x8] sm:$0xff] }
  0x20   : > { %306 = vrot.lane.b32.xlu1 %v296_v59, %s519_s16  ;;  %v286_v3 = vadd.f32 %v274_v55, %v259_v60  ;;  %v243_v5 = vadd.f32 %v235_v57, %v212_v61  ;;  %v199_v6 = vsel %vm194_vm0, %v196_v31, %v198_v62  ;;  %v281_v7 = vsel %vm271_vm2, %v278_v12, %v280_v58 }
  0x21   : > { %v210_v8 = vadd.f32 %v199_v6, %v179_v23  ;;  %v230_v9 = vsel %vm225_vm1, %v227_v36, %v229_v0  ;;  %v275_v10 = vrot.slane %v263_v2, 4  ;;  %v249_v13 = vsel %vm244_vm3, %v246_v33, %v248_v1 }
  0x22   : > { %v294_v11 = vmul.f32 0.20155142, %v286_v3  ;;  %v262_v4 = vadd.f32 %v254_v63, %v243_v5  ;;  %v318_v14 = vmul.f32 0.2031322, %v286_v3  ;;  %v320_v23 = vmul.f32 0.2031322, %v288_v51 }
  0x23   : > { %v241_v15 = vadd.f32 %v230_v9, %v210_v8  ;;  %v276_v17 = vsel %vm271_vm2, %v273_v40, %v275_v10  ;;  %v290_v25 = vmul.f32 0.19688249, %v286_v3  ;;  %v292_v26 = vmul.f32 0.19688249, %v288_v51 }
  0x24   : > { %302 = vrot.lane.b32.xlu0 %v294_v11, %s519_s16  ;;  %v289_v16 = vadd.f32 %v281_v7, %v262_v4  ;;  %326 = vrot.lane.b32.xlu2 %v318_v14, %s520_s17  ;;  %v381_v7 = vld [vmem:[%s587_s23 + $0x18] sm:$0xff] }
  0x25   : > { %v260_v18 = vadd.f32 %v249_v13, %v241_v15 }
  0x26   : > { %v297_v19 = vmul.f32 0.20155142, %v289_v16  ;;  %v321_v22 = vmul.f32 0.2031322, %v289_v16  ;;  %v293_v27 = vmul.f32 0.19688249, %v289_v16 }
  0x27   : > { %v287_v20 = vadd.f32 %v276_v17, %v260_v18 }
  0x28   : > { %308 = vrot.lane.b32.xlu1 %v297_v19, %s519_s16 }
  0x29   : > { %v295_v12 = vmul.f32 0.20155142, %v287_v20  ;;  %v319_v21 = vmul.f32 0.2031322, %v287_v20  ;;  %v291_v24 = vmul.f32 0.19688249, %v287_v20 }
  0x2c   : > { %304 = vrot.lane.b32.xlu0 %v295_v12, %s519_s16  ;;  %328 = vrot.lane.b32.xlu2 %v319_v21, %s520_s17 }
  0x30   : > { %332 = vrot.lane.b32.xlu1 %v321_v22, %s520_s17 }
  0x34   : > { %330 = vrot.lane.b32.xlu0 %v320_v23, %s520_s17  ;;  %342 = vrot.lane.b32.xlu2 %v294_v11, %s521_s18 }
  0x38   : > { %346 = vrot.lane.b32.xlu1 %v296_v59, %s521_s18  ;;  %v378_v59 = vld [vmem:[%s587_s23] sm:$0xff] }
  0x3c   : > { %344 = vrot.lane.b32.xlu0 %v295_v12, %s521_s18  ;;  %348 = vrot.lane.b32.xlu2 %v297_v19, %s521_s18 }
  0x40   : > { %364 = vrot.lane.b32.xlu1 %v291_v24, %s522_s19 }
  0x44   : > { %362 = vrot.lane.b32.xlu0 %v290_v25, %s522_s19  ;;  %366 = vrot.lane.b32.xlu2 %v292_v26, %s522_s19 }
  0x4c   : > { %368 = vrot.lane.b32.xlu0 %v293_v27, %s522_s19 }
  0x7e   : > { %v327_v28 = vpop.permute.xlu2 %326 }
  0x86   : > { %v329_v29 = vpop.permute.xlu2 %328 }
  0x8e   : > { %v343_v32 = vpop.permute.xlu2 %342 }
  0x92   : > { %v307_v30 = vpop.permute.xlu1 %306 }
  0x93   : > { %v316_v38 = vadd.f32 %v307_v30, %v292_v26 }
  0x96   : > { %v303_v31 = vpop.permute.xlu0 %302  ;;  %v349_v35 = vpop.permute.xlu2 %348 }
  0x97   : > { %v314_v45 = vadd.f32 %v303_v31, %v290_v25 }
  0x99   : > { %v338_v50 = vadd.f32 %v327_v28, %v314_v45 }
  0x9a   : > { %v309_v33 = vpop.permute.xlu1 %308 }
  0x9b   : > { %v354_v57 = vadd.f32 %v343_v32, %v338_v50  ;;  %v317_v61 = vadd.f32 %v309_v33, %v293_v27 }
  0x9e   : > { %v305_v34 = vpop.permute.xlu0 %304  ;;  %v367_v41 = vpop.permute.xlu2 %366 }
  0x9f   : > { %v315_v42 = vadd.f32 %v305_v34, %v291_v24 }
  0xa1   : > { %v339_v48 = vadd.f32 %v329_v29, %v315_v42 }
  0xa2   : > { %v333_v36 = vpop.permute.xlu1 %332 }
  0xa3   : > { %v341_v0 = vadd.f32 %v333_v36, %v317_v61 }
  0xa5   : > { %v357_v5 = vadd.f32 %v349_v35, %v341_v0 }
  0xa6   : > { %v331_v37 = vpop.permute.xlu0 %330 }
  0xa7   : > { %v340_v39 = vadd.f32 %v331_v37, %v316_v38 }
  0xaa   : > { %v347_v40 = vpop.permute.xlu1 %346 }
  0xab   : > { %v356_v43 = vadd.f32 %v347_v40, %v340_v39 }
  0xad   : > { %v376_v46 = vadd.f32 %v367_v41, %v356_v43 }
  0xae   : > { %v345_v47 = vpop.permute.xlu0 %344 }
  0xaf   : > { %v384_v49 = vsub.f32 %v380_v44, %v376_v46  ;;  %v355_v51 = vadd.f32 %v345_v47, %v339_v48 }
  0xb1   : > { %v388_v52 = vand.u32 2147483647, %v384_v49 }
  0xb2   : > { %v365_v54 = vpop.permute.xlu1 %364 }
  0xb3   : > { %v375_v55 = vadd.f32 %v365_v54, %v355_v51  ;;  %v397_v56 = vsel %vm390_vm4, %v388_v52, 0.0 }
  0xb4   : > { %398 = vadd.xlane.f32.xlu0 %v397_v56 }
  0xb5   : > { %v383_v58 = vsub.f32 %v379_v53, %v375_v55 }
  0xb6   : > { %v363_v60 = vpop.permute.xlu0 %362 }
  0xb7   : > { %v374_v62 = vadd.f32 %v363_v60, %v354_v57  ;;  %v387_v63 = vand.u32 2147483647, %v383_v58 }
  0xb9   : > { %v382_v1 = vsub.f32 %v378_v59, %v374_v62  ;;  %v394_v2 = vsel %vm390_vm4, %v387_v63, 0.0 }
  0xba   : > { %395 = vadd.xlane.f32.xlu2 %v394_v2 }
  0xbb   : > { %v386_v3 = vand.u32 2147483647, %v382_v1 }
  0xbd   : > { %v391_v6 = vsel %vm390_vm4, %v386_v3, 0.0 }
  0xbe   : > { %v369_v8 = vpop.permute.xlu0 %368  ;;  %392 = vadd.xlane.f32.xlu1 %v391_v6 }
  0xbf   : > { %v377_v9 = vadd.f32 %v369_v8, %v357_v5 }
  0xc1   : > { %v385_v10 = vsub.f32 %v381_v7, %v377_v9 }
  0xc3   : > { %v389_v11 = vand.u32 2147483647, %v385_v10 }
  0xc5   : > { %v400_v4 = vsel %vm390_vm4, %v389_v11, 0.0 }
  0xc6   : > { %401 = vadd.xlane.f32.xlu2 %v400_v4 }
 0x127   : > { %v399_v18 = vpop.xlane.xlu0 %398 }
 0x12d   : > { %v396_v13 = vpop.xlane.xlu2 %395 }
 0x131   : > { %v393_v14 = vpop.xlane.xlu1 %392 }
 0x132   : > { %v403_v15 = vadd.f32 %v396_v13, %v393_v14 }
 0x134   : > { %v404_v16 = vrot.slane %v403_v15, 4 }
 0x136   : > { %v405_v17 = vadd.f32 %v404_v16, %v403_v15 }
 0x138   : > { %v406_v20 = vrot.slane %v405_v17, 2 }
 0x139   : > { %v402_v19 = vpop.xlane.xlu2 %401 }
 0x13a   : > { %v410_v12 = vadd.f32 %v402_v19, %v399_v18  ;;  %v407_v22 = vadd.f32 %v406_v20, %v405_v17 }
 0x13c   : > { %v411_v21 = vrot.slane %v410_v12, 4  ;;  %v408_v25 = vrot.slane %v407_v22, 1 }
 0x13e   : > { %v412_v23 = vadd.f32 %v411_v21, %v410_v12  ;;  %v409_v28 = vadd.f32 %v408_v25, %v407_v22 }
 0x140   : > { %v413_v24 = vrot.slane %v412_v23, 2 }
 0x142   : > { %v414_v26 = vadd.f32 %v413_v24, %v412_v23 }
 0x144   : > { %v415_v27 = vrot.slane %v414_v26, 1 }
 0x146   : > { %v416_v29 = vadd.f32 %v415_v27, %v414_v26 }
 0x148   : > { %v417_v30 = vadd.f32 %v416_v29, %v409_v28 }
 0x14a   : > { %418 = vst [vmem:[%s171_s27] sm:$0xff] %v417_v30 }
 0x14b PF: > { %s12_s9 = sadd.s32 1, %s517_s9  }
 0x14c   : > { %p9_p5 = scmp.ge.s32.totalorder %s12_s9, 4  }
 0x14e   :  { %11 = sbr.rel (!%p9_p5) target bundleno = 1 (0x1), region = 61 }

// kernel: flow_loss_forward.7
= control target key start
LH: loop header
LB: loop body
LE: loop exit
PB: predicated region body
PF: predicated region fallthrough
CT: control target
= control target key end

     0   :  { %s1094_s9 = smov 0   ;;  %s1550_s0 = inlined_call_operand.vmem [shape: f32[2,22,22], index: 0, kind: input, shape index: {}]   ;;  %s1551_s1 = inlined_call_operand.vmem [shape: f32[2,22,22], index: 1, kind: input, shape index: {}]   ;;  %s1552_s2 = inlined_call_operand.vmem [shape: f32[2,8,128], index: 2, kind: output, shape index: {}]  }
   0x1 LB: > { %s1036_s10 = sadd.s32 4294967295, %s1071_s9   ;;  %p1040_p0 = scmp.ge.s32.totalorder %s1071_s9, 1  ;;  %s1071_s9 = sphi %s1094_s9, %s12_s9  }
   0x2   : > { %p122_p1 = scmp.lt.s32.totalorder %s1071_s9, 3 }
   0x4   : > { %p123_p2 = pnand %p1040_p0, %p122_p1 }
   0x5   : > { %p148_p3 = scmp.lt.s32.totalorder (!%p123_p2), %s1036_s10, 1  ;;  %s1073_s18 = smov (!%p123_p2), 125  }
   0x6   : > { %126 = sbr.rel (%p123_p2) target bundleno = 450 (0x1c2), region = 28  ;;  %s1074_s19 = smov (!%p123_p2), 126  }
   0x7   : > { %s1075_s20 = smov (!%p123_p2), 127   ;;  %s1076_s21 = smov (!%p123_p2), 124  }
   0x8   : > { %s1077_s22 = smov (!%p123_p2), 123   ;;  %s1078_s23 = smov (!%p123_p2), 122  }
   0xb   : > { %s1556_s10 = smov (!%p148_p3, %s1036_s10), 1  ;;  %vm176_vm0 = vcmask 1046528   ;;  %vm192_vm1 = vcmask 1045504   ;;  %vm208_vm2 = vcmask 1044480   ;;  %vm218_vm3 = vcmask 1043456  }
   0xc   : > { %s1046_s11 = smul.u32 24, %s1556_s10  ;;  %vm228_vm4 = vcmask 1042432   ;;  %vm242_vm5 = vcmask 1041408   ;;  %vm955_vm13 = vcmask 130048   ;;  %s1043_s24 = sshll.u32 %s1556_s10, 3 }
   0xd   : > { %s161_s27 = scalar_lea.vmem %s1552_s2, %s1043_s24 }
   0xe   : > { %s152_s14 = scalar_lea.vmem %s1550_s0, %s1046_s11  ;;  %s157_s17 = scalar_lea.vmem %s1551_s1, %s1046_s11 }
   0xf   : > { %v1108_v0 = vld [vmem:[%s152_s14] sm:$0xff]  ;;  %v1110_v1 = vld [vmem:[%s152_s14 + $0x8] sm:$0xff]  ;;  %v1112_v2 = vld [vmem:[%s152_s14 + $0x10] sm:$0x3f] }
  0x10   : > { %v168_v3 = vmul.f32 0.036632847, %v1108_v0  ;;  %v1116_v4 = vmul.f32 0.036632847, %v1110_v1  ;;  %v170_v5 = vmul.f32 0.11128076, %v1108_v0 }
  0x11   : > { %v171_v6 = vmul.f32 0.11128076, %v1110_v1  ;;  %v172_v7 = vmul.f32 0.11128076, %v1112_v2  ;;  %v186_v8 = vmul.f32 0.21674532, %v1108_v0 }
  0x12   : > { %v177_v9 = vrot.slane %v170_v5, 1  ;;  %v187_v10 = vmul.f32 0.21674532, %v1110_v1  ;;  %v202_v11 = vmul.f32 0.27068216, %v1108_v0  ;;  %v229_v12 = vrot.slane %v170_v5, 5 }
  0x13   : > { %v178_v13 = vrot.slane %v171_v6, 1  ;;  %v180_v14 = vrot.slane %v172_v7, 1  ;;  %v193_v15 = vrot.slane %v186_v8, 2  ;;  %v203_v16 = vmul.f32 0.27068216, %v1110_v1  ;;  %v1134_v31 = vld [vmem:[%s157_s17] sm:$0xff] }
  0x14   : > { %v194_v17 = vrot.slane %v187_v10, 2  ;;  %v209_v18 = vrot.slane %v202_v11, 3  ;;  %v219_v19 = vrot.slane %v186_v8, 4  ;;  %v220_v20 = vrot.slane %v187_v10, 4  ;;  %v1138_v36 = vld [vmem:[%s157_s17 + $0x8] sm:$0xff] }
  0x15   : > { %v179_v21 = vsel %vm176_vm0, %v177_v9, %v178_v13  ;;  %v181_v22 = vsel %vm176_vm0, %v178_v13, %v180_v14  ;;  %v210_v23 = vrot.slane %v203_v16, 3  ;;  %v230_v24 = vrot.slane %v171_v6, 5  ;;  %v1144_v45 = vld [vmem:[%s157_s17 + $0x10] sm:$0x3f] }
  0x16   : > { %v184_v25 = vadd.f32 %v179_v21, %v168_v3  ;;  %v195_v26 = vsel %vm192_vm1, %v193_v15, %v194_v17  ;;  %v185_v27 = vadd.f32 %v181_v22, %v1116_v4  ;;  %v243_v29 = vrot.slane %v168_v3, 6 }
  0x17   : > { %v211_v28 = vsel %vm208_vm2, %v209_v18, %v210_v23  ;;  %v244_v30 = vrot.slane %v1116_v4, 6  ;;  %v188_v33 = vmul.f32 0.21674532, %v1112_v2  ;;  %v204_v34 = vmul.f32 0.27068216, %v1112_v2 }
  0x18   : > { %v200_v32 = vadd.f32 %v195_v26, %v184_v25  ;;  %v232_v35 = vrot.slane %v172_v7, 5  ;;  %v221_v37 = vsel %vm218_vm3, %v219_v19, %v220_v20  ;;  %v231_v38 = vsel %vm228_vm4, %v229_v12, %v230_v24 }
  0x19   : > { %v245_v39 = vsel %vm242_vm5, %v243_v29, %v244_v30  ;;  %v238_v40 = vmul.f32 0.036632847, %v1112_v2  ;;  %v196_v42 = vrot.slane %v188_v33, 2  ;;  %v212_v43 = vrot.slane %v204_v34, 3 }
  0x1a   : > { %v216_v41 = vadd.f32 %v211_v28, %v200_v32  ;;  %v222_v44 = vrot.slane %v188_v33, 4  ;;  %v233_v46 = vsel %vm228_vm4, %v230_v24, %v232_v35  ;;  %v1148_v47 = vmul.f32 0.036632847, %v1134_v31 }
  0x1b   : > { %v1151_v48 = vmul.f32 0.11128076, %v1134_v31  ;;  %v1154_v49 = vmul.f32 0.11128076, %v1138_v36  ;;  %v197_v51 = vsel %vm192_vm1, %v194_v17, %v196_v42  ;;  %v213_v52 = vsel %vm208_vm2, %v210_v23, %v212_v43 }
  0x1c   : > { %v226_v50 = vadd.f32 %v221_v37, %v216_v41  ;;  %v246_v53 = vrot.slane %v238_v40, 6  ;;  %v201_v54 = vadd.f32 %v197_v51, %v185_v27  ;;  %v223_v55 = vsel %vm218_vm3, %v220_v20, %v222_v44 }
  0x1d   : > { %v1160_v56 = vmul.f32 0.11128076, %v1144_v45  ;;  %v324_v57 = vrot.slane %v1151_v48, 1  ;;  %v325_v59 = vrot.slane %v1154_v49, 1  ;;  %v333_v60 = vmul.f32 0.21674532, %v1134_v31 }
  0x1e   : > { %v236_v58 = vadd.f32 %v231_v38, %v226_v50  ;;  %v1166_v61 = vmul.f32 0.21674532, %v1138_v36  ;;  %v217_v62 = vadd.f32 %v213_v52, %v201_v54  ;;  %v348_v3 = vmul.f32 0.27068216, %v1134_v31 }
  0x1f   : > { %v327_v63 = vrot.slane %v1160_v56, 1  ;;  %v349_v4 = vmul.f32 0.27068216, %v1138_v36  ;;  %v326_v6 = vsel %vm176_vm0, %v324_v57, %v325_v59  ;;  %v339_v7 = vrot.slane %v333_v60, 2 }
  0x20   : > { %v1171_v5 = vadd.f32 %v245_v39, %v236_v58  ;;  %v340_v8 = vrot.slane %v1166_v61, 2  ;;  %v227_v9 = vadd.f32 %v223_v55, %v217_v62  ;;  %v247_v13 = vsel %vm242_vm5, %v244_v30, %v246_v53 }
  0x21   : > { %v1182_v15 = vmul.f32 0.036632847, %v1138_v36  ;;  %v331_v16 = vadd.f32 %v326_v6, %v1148_v47  ;;  %v328_v17 = vsel %vm176_vm0, %v325_v59, %v327_v63  ;;  %v354_v19 = vrot.slane %v348_v3, 3 }
  0x22   : > { %v278_v10 = vmul.f32 0.27068216, %v1171_v5  ;;  %v1177_v11 = vmul.f32 0.21674532, %v1171_v5  ;;  %v254_v12 = vmul.f32 0.11128076, %v1171_v5  ;;  %v237_v14 = vadd.f32 %v233_v46, %v227_v9 }
  0x23   : > { %v341_v18 = vsel %vm192_vm1, %v339_v7, %v340_v8  ;;  %v355_v20 = vrot.slane %v349_v4, 3  ;;  %v335_v22 = vmul.f32 0.21674532, %v1144_v45  ;;  %v332_v23 = vadd.f32 %v328_v17, %v1182_v15 }
  0x24   : > { %282 = vrot.lane.b32.xlu2 %v278_v10, %s1073_s18  ;;  %270 = vrot.lane.b32.xlu1 %v1177_v11, %s1074_s19  ;;  %v251_v21 = vadd.f32 %v247_v13, %v237_v14  ;;  %v346_v24 = vadd.f32 %v341_v18, %v331_v16  ;;  %v363_v25 = vrot.slane %v333_v60, 4  ;;  %v364_v26 = vrot.slane %v1166_v61, 4 }
  0x25   : > { %258 = vrot.lane.b32.xlu0 %v254_v12, %s1075_s20  ;;  %v356_v29 = vsel %vm208_vm2, %v354_v19, %v355_v20  ;;  %v342_v30 = vrot.slane %v335_v22, 2  ;;  %v350_v33 = vmul.f32 0.27068216, %v1144_v45  ;;  %v372_v38 = vrot.slane %v1151_v48, 5 }
  0x26   : > { %v279_v27 = vmul.f32 0.27068216, %v251_v21  ;;  %v267_v28 = vmul.f32 0.21674532, %v251_v21  ;;  %v1195_v32 = vmul.f32 0.11128076, %v251_v21  ;;  %v361_v35 = vadd.f32 %v356_v29, %v346_v24 }
  0x27   : > { %v343_v34 = vsel %vm192_vm1, %v340_v8, %v342_v30  ;;  %v365_v37 = vsel %vm218_vm3, %v363_v25, %v364_v26  ;;  %v357_v39 = vrot.slane %v350_v33, 3  ;;  %v373_v40 = vrot.slane %v1154_v49, 5 }
  0x28   : > { %v347_v41 = vadd.f32 %v343_v34, %v332_v23  ;;  %v459_v42 = vmul.f32 %v1110_v1, %v1110_v1  ;;  %v1208_v43 = vmul.f32 %v1112_v2, %v1112_v2  ;;  %v366_v46 = vrot.slane %v335_v22, 4 }
  0x29   : > { %v358_v44 = vsel %vm208_vm2, %v355_v20, %v357_v39  ;;  %v385_v48 = vrot.slane %v1148_v47, 6  ;;  %v386_v50 = vrot.slane %v1182_v15, 6  ;;  %v370_v51 = vadd.f32 %v365_v37, %v361_v35 }
  0x2a   : > { %v381_v49 = vmul.f32 0.036632847, %v1144_v45  ;;  %v374_v52 = vsel %vm228_vm4, %v372_v38, %v373_v40  ;;  %v362_v53 = vadd.f32 %v358_v44, %v347_v41  ;;  %v1217_v54 = vmul.f32 0.11128076, %v459_v42 }
  0x2b   : > { %v1220_v55 = vmul.f32 0.11128076, %v1208_v43  ;;  %v367_v57 = vsel %vm218_vm3, %v364_v26, %v366_v46  ;;  %v375_v58 = vrot.slane %v1160_v56, 5  ;;  %v387_v59 = vsel %vm242_vm5, %v385_v48, %v386_v50 }
  0x2c   : > { %284 = vrot.lane.b32.xlu2 %v279_v27, %s1073_s18  ;;  %272 = vrot.lane.b32.xlu1 %v267_v28, %s1074_s19  ;;  %v379_v47 = vadd.f32 %v374_v52, %v370_v51  ;;  %v388_v60 = vrot.slane %v381_v49, 6  ;;  %v1225_v61 = vmul.f32 0.21674532, %v459_v42  ;;  %v458_v62 = vmul.f32 %v1108_v0, %v1108_v0 }
  0x2d   : > { %260 = vrot.lane.b32.xlu0 %v1195_v32, %s1075_s20  ;;  %v371_v63 = vadd.f32 %v367_v57, %v362_v53  ;;  %v470_v3 = vrot.slane %v1217_v54, 1  ;;  %v472_v56 = vrot.slane %v1220_v55, 1  ;;  %v480_v4 = vmul.f32 0.21674532, %v1208_v43 }
  0x2e   : > { %v376_v6 = vsel %vm228_vm4, %v373_v40, %v375_v58  ;;  %v1237_v7 = vmul.f32 0.036632847, %v251_v21  ;;  %v1240_v8 = vmul.f32 0.036632847, %v1171_v5  ;;  %v1242_v9 = vadd.f32 %v387_v59, %v379_v47 }
  0x2f   : > { %v389_v10 = vsel %vm242_vm5, %v386_v50, %v388_v60  ;;  %v1247_v13 = vmul.f32 0.11128076, %v458_v62  ;;  %v380_v14 = vadd.f32 %v376_v6, %v371_v63  ;;  %v473_v15 = vsel %vm176_vm0, %v470_v3, %v472_v56 }
  0x30   : > { %v487_v16 = vrot.slane %v480_v4, 2  ;;  %v1252_v18 = vmul.f32 0.21674532, %v458_v62  ;;  %v604_v5 = vmul.f32 %v1138_v36, %v1138_v36  ;;  %v1258_v19 = vmul.f32 %v1144_v45, %v1144_v45 }
  0x31   : > { %v469_v17 = vrot.slane %v1247_v13, 1  ;;  %v603_v20 = vmul.f32 %v1134_v31, %v1134_v31  ;;  %v1263_v21 = vmul.f32 0.21674532, %v1242_v9  ;;  %v494_v23 = vmul.f32 0.27068216, %v459_v42 }
  0x32   : > { %v495_v24 = vmul.f32 0.27068216, %v1208_v43  ;;  %v1271_v25 = vadd.f32 %v389_v10, %v380_v14  ;;  %v1274_v27 = vmul.f32 0.036632847, %v458_v62  ;;  %v484_v30 = vrot.slane %v1252_v18, 2 }
  0x33   : > { %v471_v29 = vsel %vm176_vm0, %v469_v17, %v470_v3  ;;  %v1280_v33 = vmul.f32 0.11128076, %v604_v5  ;;  %v1283_v34 = vmul.f32 0.11128076, %v1258_v19  ;;  %v1286_v35 = vmul.f32 0.11128076, %v1242_v9 }
  0x34   : > { %292 = vrot.lane.b32.xlu1 %v267_v28, %s1076_s21  ;;  %298 = vrot.lane.b32.xlu2 %v254_v12, %s1077_s22  ;;  %v1245_v12 = vmul.f32 0.036632847, %v459_v42  ;;  %v493_v28 = vmul.f32 0.27068216, %v458_v62  ;;  %v420_v37 = vmul.f32 0.27068216, %v1242_v9  ;;  %v476_v46 = vadd.f32 %v471_v29, %v1274_v27 }
  0x35   : > { %290 = vrot.lane.b32.xlu0 %v1177_v11, %s1076_s21  ;;  %v485_v11 = vrot.slane %v1225_v61, 2  ;;  %v1289_v38 = vmul.f32 0.11128076, %v603_v20  ;;  %v500_v39 = vrot.slane %v494_v23, 3  ;;  %v502_v40 = vrot.slane %v495_v24, 3 }
  0x36   : > { %v477_v22 = vadd.f32 %v473_v15, %v1245_v12  ;;  %v511_v41 = vrot.slane %v480_v4, 4  ;;  %v1293_v42 = vmul.f32 0.11128076, %v1271_v25  ;;  %v499_v48 = vrot.slane %v493_v28, 3 }
  0x37   : > { %v488_v26 = vsel %vm192_vm1, %v485_v11, %v487_v16  ;;  %v486_v50 = vsel %vm192_vm1, %v484_v30, %v485_v11  ;;  %v615_v51 = vrot.slane %v1280_v33, 1  ;;  %v617_v49 = vrot.slane %v1283_v34, 1 }
  0x38   : > { %v492_v44 = vadd.f32 %v488_v26, %v477_v22  ;;  %v1299_v52 = vmul.f32 0.21674532, %v604_v5  ;;  %v518_v53 = vrot.slane %v1217_v54, 5  ;;  %v520_v57 = vrot.slane %v1220_v55, 5 }
  0x39   : > { %v614_v58 = vrot.slane %v1289_v38, 1  ;;  %v1304_v59 = vmul.f32 0.21674532, %v603_v20  ;;  %v503_v47 = vsel %vm208_vm2, %v500_v39, %v502_v40  ;;  %v508_v62 = vrot.slane %v1252_v18, 4 }
  0x3a   : > { %v491_v54 = vadd.f32 %v486_v50, %v476_v46  ;;  %v501_v55 = vsel %vm208_vm2, %v499_v48, %v500_v39  ;;  %v1315_v63 = vmul.f32 0.036632847, %v603_v20  ;;  %v1317_v3 = vmul.f32 0.036632847, %v604_v5 }
  0x3b   : > { %v630_v56 = vrot.slane %v1299_v52, 2  ;;  %v639_v4 = vmul.f32 0.27068216, %v604_v5  ;;  %v625_v6 = vmul.f32 0.21674532, %v1258_v19  ;;  %v616_v10 = vsel %vm176_vm0, %v614_v58, %v615_v51 }
  0x3c   : > { %310 = vrot.lane.b32.xlu2 %v1237_v7, %s1078_s23  ;;  %308 = vrot.lane.b32.xlu1 %v1240_v8, %s1078_s23  ;;  %v629_v14 = vrot.slane %v1304_v59, 2  ;;  %v638_v15 = vmul.f32 0.27068216, %v603_v20  ;;  %v640_v11 = vmul.f32 0.27068216, %v1258_v19  ;;  %v507_v18 = vadd.f32 %v503_v47, %v492_v44 }
  0x3d   : > { %300 = vrot.lane.b32.xlu0 %v1195_v32, %s1077_s22  ;;  %v509_v32 = vrot.slane %v1225_v61, 4  ;;  %v526_v61 = vmul.f32 0.036632847, %v1208_v43  ;;  %v618_v43 = vsel %vm176_vm0, %v615_v51, %v617_v49  ;;  %v421_v16 = vmul.f32 0.27068216, %v1271_v25 }
  0x3e   : > { %v409_v17 = vmul.f32 0.21674532, %v1271_v25  ;;  %v632_v22 = vrot.slane %v625_v6, 2  ;;  %v506_v23 = vadd.f32 %v501_v55, %v491_v54  ;;  %v517_v5 = vrot.slane %v1247_v13, 5 }
  0x3f   : > { %v512_v60 = vsel %vm218_vm3, %v509_v32, %v511_v41  ;;  %v510_v24 = vsel %vm218_vm3, %v508_v62, %v509_v32  ;;  %v622_v26 = vadd.f32 %v618_v43, %v1317_v3  ;;  %v621_v28 = vadd.f32 %v616_v10, %v1315_v63 }
  0x40   : > { %v645_v29 = vrot.slane %v639_v4, 3  ;;  %v633_v20 = vsel %vm192_vm1, %v630_v56, %v632_v22  ;;  %v647_v30 = vrot.slane %v640_v11, 3  ;;  %v631_v39 = vsel %vm192_vm1, %v629_v14, %v630_v56 }
  0x41   : > { %v644_v40 = vrot.slane %v638_v15, 3  ;;  %v516_v41 = vadd.f32 %v512_v60, %v507_v18  ;;  %v521_v44 = vsel %vm228_vm4, %v518_v53, %v520_v57  ;;  %v531_v46 = vrot.slane %v1245_v12, 6 }
  0x42   : > { %v533_v48 = vrot.slane %v526_v61, 6  ;;  %v515_v13 = vadd.f32 %v510_v24, %v506_v23  ;;  %v519_v32 = vsel %vm228_vm4, %v517_v5, %v518_v53  ;;  %v530_v50 = vrot.slane %v1274_v27, 6 }
  0x43   : > { %v637_v51 = vadd.f32 %v633_v20, %v622_v26  ;;  %v636_v49 = vadd.f32 %v631_v39, %v621_v28  ;;  %v654_v58 = vrot.slane %v1299_v52, 4  ;;  %v648_v57 = vsel %vm208_vm2, %v645_v29, %v647_v30 }
  0x44   : > { %412 = vrot.lane.b32.xlu2 %v1263_v21, %s1074_s19  ;;  %402 = vrot.lane.b32.xlu1 %v1293_v42, %s1075_s20  ;;  %v656_v47 = vrot.slane %v625_v6, 4  ;;  %v646_v12 = vsel %vm208_vm2, %v644_v40, %v645_v29  ;;  %v653_v60 = vrot.slane %v1304_v59, 4  ;;  %v525_v61 = vadd.f32 %v521_v44, %v516_v41 }
  0x45   : > { %400 = vrot.lane.b32.xlu0 %v1286_v35, %s1075_s20  ;;  %v524_v62 = vadd.f32 %v519_v32, %v515_v13  ;;  %v532_v53 = vsel %vm242_vm5, %v530_v50, %v531_v46  ;;  %v663_v27 = vrot.slane %v1280_v33, 5  ;;  %v652_v54 = vadd.f32 %v648_v57, %v637_v51 }
  0x46   : > { %v651_v55 = vadd.f32 %v646_v12, %v636_v49  ;;  %v657_v43 = vsel %vm218_vm3, %v654_v58, %v656_v47  ;;  %v665_v52 = vrot.slane %v1283_v34, 5  ;;  %v671_v56 = vmul.f32 0.036632847, %v1258_v19 }
  0x47   : > { %v655_v4 = vsel %vm218_vm3, %v653_v60, %v654_v58  ;;  %v662_v59 = vrot.slane %v1289_v38, 5  ;;  %v1359_v33 = vadd.f32 %v532_v53, %v524_v62  ;;  %v661_v10 = vadd.f32 %v657_v43, %v652_v54 }
  0x48   : > { %v660_v34 = vadd.f32 %v655_v4, %v651_v55  ;;  %v676_v19 = vrot.slane %v1317_v3, 6  ;;  %v666_v14 = vsel %vm228_vm4, %v663_v27, %v665_v52  ;;  %v678_v15 = vrot.slane %v671_v56, 6 }
  0x49   : > { %v664_v38 = vsel %vm228_vm4, %v662_v59, %v663_v27  ;;  %v553_v23 = vmul.f32 0.21674532, %v1359_v33  ;;  %v565_v30 = vmul.f32 0.27068216, %v1359_v33  ;;  %v748_v39 = vmul.f32 %v1134_v31, %v1108_v0 }
  0x4a   : > { %v669_v18 = vadd.f32 %v664_v38, %v660_v34  ;;  %v749_v40 = vmul.f32 %v1138_v36, %v1110_v1  ;;  %v750_v41 = vmul.f32 %v1144_v45, %v1112_v2  ;;  %v1426_v1 = vmul.f32 0.036632847, %v1242_v9 }
  0x4b   : > { %v768_v45 = vmul.f32 0.21674532, %v748_v39  ;;  %v1430_v51 = vmul.f32 0.036632847, %v748_v39  ;;  %v783_v47 = vmul.f32 0.27068216, %v748_v39 }
  0x4c   : > { %426 = vrot.lane.b32.xlu2 %v421_v16, %s1073_s18  ;;  %424 = vrot.lane.b32.xlu1 %v420_v37, %s1073_s18  ;;  %v534_v37 = vsel %vm242_vm5, %v531_v46, %v533_v48  ;;  %v1371_v16 = vmul.f32 0.11128076, %v1359_v33  ;;  %v1418_v46 = vmul.f32 0.11128076, %v748_v39  ;;  %v1420_v48 = vmul.f32 0.11128076, %v749_v40 }
  0x4d   : > { %414 = vrot.lane.b32.xlu0 %v409_v17, %s1074_s19  ;;  %v1357_v6 = vadd.f32 %v534_v37, %v525_v61  ;;  %v755_v13 = vmul.f32 0.11128076, %v750_v41  ;;  %v769_v32 = vmul.f32 0.21674532, %v749_v40  ;;  %v770_v50 = vmul.f32 0.21674532, %v750_v41 }
  0x4e   : > { %v759_v2 = vrot.slane %v1418_v46, 1  ;;  %v760_v31 = vrot.slane %v1420_v48, 1  ;;  %v1432_v49 = vmul.f32 0.036632847, %v749_v40  ;;  %v774_v57 = vrot.slane %v768_v45, 2 }
  0x4f   : > { %v1368_v11 = vmul.f32 0.11128076, %v1357_v6  ;;  %v554_v28 = vmul.f32 0.21674532, %v1357_v6  ;;  %v566_v20 = vmul.f32 0.27068216, %v1357_v6 }
  0x50   : > { %v762_v36 = vrot.slane %v755_v13, 1  ;;  %v761_v9 = vsel %vm176_vm0, %v759_v2, %v760_v31  ;;  %v775_v12 = vrot.slane %v769_v32, 2  ;;  %v784_v60 = vmul.f32 0.27068216, %v749_v40 }
  0x51   : > { %v777_v61 = vrot.slane %v770_v50, 2  ;;  %v785_v37 = vmul.f32 0.27068216, %v750_v41  ;;  %v1443_v53 = vmul.f32 0.036632847, %v1271_v25  ;;  %v766_v27 = vadd.f32 %v761_v9, %v1430_v51 }
  0x52   : > { %v763_v58 = vsel %vm176_vm0, %v760_v31, %v762_v36  ;;  %v789_v55 = vrot.slane %v783_v47, 3  ;;  %v776_v43 = vsel %vm192_vm1, %v774_v57, %v775_v12  ;;  %v790_v52 = vrot.slane %v784_v60, 3 }
  0x53   : > { %v767_v54 = vadd.f32 %v763_v58, %v1432_v49  ;;  %v778_v56 = vsel %vm192_vm1, %v775_v12, %v777_v61  ;;  %v792_v4 = vrot.slane %v785_v37, 3  ;;  %v781_v59 = vadd.f32 %v776_v43, %v766_v27 }
  0x54   : > { %440 = vrot.lane.b32.xlu2 %v1286_v35, %s1077_s22  ;;  %434 = vrot.lane.b32.xlu1 %v409_v17, %s1076_s21  ;;  %v675_v35 = vrot.slane %v1315_v63, 6  ;;  %v670_v17 = vadd.f32 %v666_v14, %v661_v10  ;;  %v791_v10 = vsel %vm208_vm2, %v789_v55, %v790_v52  ;;  %v799_v34 = vrot.slane %v769_v32, 4 }
  0x55   : > { %432 = vrot.lane.b32.xlu0 %v1263_v21, %s1076_s21  ;;  %v679_v21 = vsel %vm242_vm5, %v676_v19, %v678_v15  ;;  %v782_v25 = vadd.f32 %v778_v56, %v767_v54  ;;  %v801_v14 = vrot.slane %v770_v50, 4  ;;  %v798_v38 = vrot.slane %v768_v45, 4 }
  0x56   : > { %v677_v22 = vsel %vm242_vm5, %v675_v35, %v676_v19  ;;  %v1379_v3 = vadd.f32 %v679_v21, %v670_v17  ;;  %v793_v19 = vsel %vm208_vm2, %v790_v52, %v792_v4  ;;  %v796_v35 = vadd.f32 %v791_v10, %v781_v59 }
  0x57   : > { %v1383_v63 = vadd.f32 %v677_v22, %v669_v18  ;;  %v797_v17 = vadd.f32 %v793_v19, %v782_v25  ;;  %v802_v18 = vsel %vm218_vm3, %v799_v34, %v801_v14  ;;  %v810_v21 = vrot.slane %v755_v13, 5 }
  0x58   : > { %v1387_v24 = vmul.f32 0.11128076, %v1379_v3  ;;  %v711_v44 = vmul.f32 0.27068216, %v1379_v3  ;;  %v816_v22 = vmul.f32 0.036632847, %v750_v41 }
  0x59   : > { %v1390_v5 = vmul.f32 0.11128076, %v1383_v63  ;;  %v698_v26 = vmul.f32 0.21674532, %v1383_v63  ;;  %v710_v29 = vmul.f32 0.27068216, %v1383_v63 }
  0x5a   : > { %v820_v41 = vrot.slane %v1430_v51, 6  ;;  %v540_v13 = vmul.f32 0.036632847, %v1357_v6 }
  0x5c   : > { %547 = vrot.lane.b32.xlu2 %v1368_v11, %s1075_s20  ;;  %545 = vrot.lane.b32.xlu1 %v1371_v16, %s1075_s20 }
  0x5d   : > { %442 = vrot.lane.b32.xlu0 %v1293_v42, %s1077_s22  ;;  %v699_v42 = vmul.f32 0.21674532, %v1379_v3 }
  0x64   : > { %557 = vrot.lane.b32.xlu2 %v553_v23, %s1074_s19  ;;  %692 = vrot.lane.b32.xlu1 %v1387_v24, %s1075_s20 }
  0x65   : > { %690 = vrot.lane.b32.xlu0 %v1390_v5, %s1075_s20 }
  0x6c   : > { %704 = vrot.lane.b32.xlu2 %v699_v42, %s1074_s19  ;;  %702 = vrot.lane.b32.xlu1 %v698_v26, %s1074_s19 }
  0x6d   : > { %559 = vrot.lane.b32.xlu0 %v554_v28, %s1074_s19 }
  0x74   : > { %714 = vrot.lane.b32.xlu2 %v710_v29, %s1073_s18  ;;  %571 = vrot.lane.b32.xlu1 %v566_v20, %s1073_s18  ;;  %v823_v20 = vrot.slane %v816_v22, 6 }
  0x75   : > { %569 = vrot.lane.b32.xlu0 %v565_v30, %s1073_s18 }
  0x7c   : > { %579 = vrot.lane.b32.xlu2 %v554_v28, %s1076_s21  ;;  %577 = vrot.lane.b32.xlu1 %v553_v23, %s1076_s21  ;;  %v800_v23 = vsel %vm218_vm3, %v798_v38, %v799_v34  ;;  %v821_v28 = vrot.slane %v1432_v49, 6 }
  0x7d   : > { %716 = vrot.lane.b32.xlu0 %v711_v44, %s1073_s18 }
  0x7e   : > { %v1423_v0 = vpop.permute.xlu2 %282  ;;  %v824_v31 = vsel %vm242_vm5, %v821_v28, %v823_v20  ;;  %v822_v45 = vsel %vm242_vm5, %v820_v41, %v821_v28 }
  0x84   : > { %450 = vrot.lane.b32.xlu2 %v1426_v1, %s1078_s23  ;;  %724 = vrot.lane.b32.xlu1 %v699_v42, %s1076_s21  ;;  %v807_v42 = vrot.slane %v1418_v46, 5  ;;  %v1476_v46 = vmul.f32 0.036632847, %v1383_v63 }
  0x85   : > { %722 = vrot.lane.b32.xlu0 %v698_v26, %s1076_s21  ;;  %v806_v26 = vadd.f32 %v802_v18, %v797_v17 }
  0x86   : > { %v1440_v62 = vpop.permute.xlu2 %284 }
  0x8c   : > { %585 = vrot.lane.b32.xlu1 %v1371_v16, %s1077_s22  ;;  %587 = vrot.lane.b32.xlu2 %v1368_v11, %s1077_s22  ;;  %v1458_v16 = vmul.f32 0.036632847, %v1359_v33  ;;  %v808_v11 = vrot.slane %v1420_v48, 5  ;;  %v805_v33 = vadd.f32 %v800_v23, %v796_v35 }
  0x8d   : > { %452 = vrot.lane.b32.xlu0 %v1443_v53, %s1078_s23 }
  0x8e   : > { %v299_v15 = vpop.permute.xlu2 %298  ;;  %v811_v29 = vsel %vm228_vm4, %v808_v11, %v810_v21  ;;  %v809_v40 = vsel %vm228_vm4, %v807_v42, %v808_v11 }
  0x8f   : > { %v815_v48 = vadd.f32 %v811_v29, %v806_v26  ;;  %v814_v2 = vadd.f32 %v809_v40, %v805_v33 }
  0x91   : > { %v828_v32 = vadd.f32 %v824_v31, %v815_v48 }
  0x93   : > { %v832_v49 = vmul.f32 0.11128076, %v828_v32  ;;  %v856_v54 = vmul.f32 0.27068216, %v828_v32  ;;  %v1507_v35 = vmul.f32 0.036632847, %v828_v32 }
  0x94   : > { %732 = vrot.lane.b32.xlu1 %v1387_v24, %s1077_s22  ;;  %595 = vrot.lane.b32.xlu2 %v1458_v16, %s1078_s23 }
  0x95   : > { %730 = vrot.lane.b32.xlu0 %v1390_v5, %s1077_s22  ;;  %v1479_v5 = vmul.f32 0.036632847, %v1379_v3  ;;  %v827_v3 = vadd.f32 %v822_v45, %v814_v2 }
  0x96   : > { %v271_v30 = vpop.permute.xlu1 %270  ;;  %v311_v39 = vpop.permute.xlu2 %310 }
  0x97   : > { %v259_v24 = vpop.permute.xlu0 %258  ;;  %v831_v9 = vmul.f32 0.11128076, %v827_v3  ;;  %v843_v57 = vmul.f32 0.21674532, %v827_v3  ;;  %v855_v27 = vmul.f32 0.27068216, %v827_v3 }
  0x98   : > { %v264_v44 = vadd.f32 %v259_v24, %v1240_v8  ;;  %v1505_v38 = vmul.f32 0.036632847, %v827_v3 }
  0x9a   : > { %v276_v36 = vadd.f32 %v271_v30, %v264_v44 }
  0x9c   : > { %740 = vrot.lane.b32.xlu1 %v1476_v46, %s1078_s23  ;;  %v288_v8 = vadd.f32 %v1423_v0, %v276_v36  ;;  %742 = vrot.lane.b32.xlu2 %v1479_v5, %s1078_s23 }
  0x9d   : > { %597 = vrot.lane.b32.xlu0 %v540_v13, %s1078_s23 }
  0x9e   : > { %v273_v63 = vpop.permute.xlu1 %272  ;;  %v413_v6 = vpop.permute.xlu2 %412 }
  0x9f   : > { %v261_v50 = vpop.permute.xlu0 %260 }
  0xa0   : > { %v265_v51 = vadd.f32 %v261_v50, %v1237_v7  ;;  %v844_v7 = vmul.f32 0.21674532, %v828_v32 }
  0xa2   : > { %v277_v58 = vadd.f32 %v273_v63, %v265_v51 }
  0xa4   : > { %837 = vrot.lane.b32.xlu1 %v832_v49, %s1075_s20  ;;  %v289_v47 = vadd.f32 %v1440_v62, %v277_v58  ;;  %847 = vrot.lane.b32.xlu2 %v843_v57, %s1074_s19 }
  0xa5   : > { %835 = vrot.lane.b32.xlu0 %v831_v9, %s1075_s20 }
  0xa6   : > { %v293_v0 = vpop.permute.xlu1 %292  ;;  %v427_v12 = vpop.permute.xlu2 %426 }
  0xa7   : > { %v297_v60 = vadd.f32 %v293_v0, %v289_v47  ;;  %v291_v61 = vpop.permute.xlu0 %290 }
  0xa8   : > { %v296_v37 = vadd.f32 %v291_v61, %v288_v8 }
  0xaa   : > { %v304_v55 = vadd.f32 %v299_v15, %v296_v37 }
  0xac   : > { %859 = vrot.lane.b32.xlu1 %v855_v27, %s1073_s18  ;;  %861 = vrot.lane.b32.xlu2 %v856_v54, %s1073_s18 }
  0xad   : > { %849 = vrot.lane.b32.xlu0 %v844_v7, %s1074_s19 }
  0xae   : > { %v441_v62 = vpop.permute.xlu2 %440  ;;  %v309_v43 = vpop.permute.xlu1 %308 }
  0xaf   : > { %v301_v52 = vpop.permute.xlu0 %300  ;;  %v314_v56 = vadd.f32 %v309_v43, %v304_v55 }
  0xb0   : > { %v305_v4 = vadd.f32 %v301_v52, %v297_v60 }
  0xb1   : > { %v893_v32 = vmul.f32 %v314_v56, %v314_v56 }
  0xb2   : > { %v1498_v59 = vadd.f32 %v311_v39, %v305_v4 }
  0xb4   : > { %869 = vrot.lane.b32.xlu1 %v844_v7, %s1076_s21  ;;  %875 = vrot.lane.b32.xlu2 %v831_v9, %s1077_s22  ;;  %v894_v7 = vmul.f32 %v1498_v59, %v1498_v59 }
  0xb5   : > { %867 = vrot.lane.b32.xlu0 %v843_v57, %s1076_s21 }
  0xb6   : > { %v548_v25 = vpop.permute.xlu2 %547  ;;  %v403_v10 = vpop.permute.xlu1 %402 }
  0xb7   : > { %v552_v34 = vadd.f32 %v548_v25, %v540_v13  ;;  %v401_v19 = vpop.permute.xlu0 %400  ;;  %v407_v14 = vadd.f32 %v403_v10, %v1443_v53 }
  0xb8   : > { %v406_v15 = vadd.f32 %v401_v19, %v1426_v1 }
  0xba   : > { %v418_v17 = vadd.f32 %v413_v6, %v406_v15 }
  0xbc   : > { %885 = vrot.lane.b32.xlu1 %v1505_v38, %s1078_s23  ;;  %887 = vrot.lane.b32.xlu2 %v1507_v35, %s1078_s23 }
  0xbd   : > { %877 = vrot.lane.b32.xlu0 %v832_v49, %s1077_s22 }
  0xbe   : > { %v558_v11 = vpop.permute.xlu2 %557  ;;  %v425_v18 = vpop.permute.xlu1 %424 }
  0xbf   : > { %v415_v21 = vpop.permute.xlu0 %414  ;;  %v430_v22 = vadd.f32 %v425_v18, %v418_v17 }
  0xc0   : > { %v419_v53 = vadd.f32 %v415_v21, %v407_v14 }
  0xc2   : > { %v431_v23 = vadd.f32 %v427_v12, %v419_v53 }
  0xc6   : > { %v705_v1 = vpop.permute.xlu2 %704  ;;  %v435_v42 = vpop.permute.xlu1 %434 }
  0xc7   : > { %v433_v26 = vpop.permute.xlu0 %432  ;;  %v439_v33 = vadd.f32 %v435_v42, %v431_v23 }
  0xc8   : > { %v438_v28 = vadd.f32 %v433_v26, %v430_v22 }
  0xca   : > { %v446_v29 = vadd.f32 %v441_v62, %v438_v28 }
  0xce   : > { %v715_v20 = vpop.permute.xlu2 %714  ;;  %v546_v30 = vpop.permute.xlu1 %545 }
  0xcf   : > { %v443_v39 = vpop.permute.xlu0 %442  ;;  %v551_v40 = vadd.f32 %v546_v30, %v1458_v16 }
  0xd0   : > { %v447_v41 = vadd.f32 %v443_v39, %v439_v33 }
  0xd1   : > { %v563_v57 = vadd.f32 %v558_v11, %v551_v40 }
  0xd6   : > { %v580_v24 = vpop.permute.xlu2 %579  ;;  %v693_v44 = vpop.permute.xlu1 %692 }
  0xd7   : > { %v691_v48 = vpop.permute.xlu0 %690  ;;  %v697_v13 = vadd.f32 %v693_v44, %v1479_v5 }
  0xd8   : > { %v696_v43 = vadd.f32 %v691_v48, %v1476_v46 }
  0xd9   : > { %v709_v27 = vadd.f32 %v705_v1, %v697_v13 }
  0xde   : > { %v451_v2 = vpop.permute.xlu2 %450  ;;  %v703_v31 = vpop.permute.xlu1 %702 }
  0xdf   : > { %v456_v36 = vadd.f32 %v451_v2, %v446_v29  ;;  %v560_v45 = vpop.permute.xlu0 %559  ;;  %v708_v10 = vadd.f32 %v703_v31, %v696_v43 }
  0xe0   : > { %v564_v4 = vadd.f32 %v560_v45, %v552_v34 }
  0xe1   : > { %v895_v8 = vmul.f32 %v456_v36, %v456_v36  ;;  %v1516_v3 = vmul.f32 %v456_v36, %v314_v56  ;;  %v720_v21 = vadd.f32 %v715_v20, %v708_v10 }
  0xe3   : > { %v915_v63 = vadd.f32 %v895_v8, %v893_v32 }
  0xe6   : > { %v572_v6 = vpop.permute.xlu1 %571  ;;  %v588_v16 = vpop.permute.xlu2 %587 }
  0xe7   : > { %v570_v50 = vpop.permute.xlu0 %569  ;;  %v576_v14 = vadd.f32 %v572_v6, %v564_v4 }
  0xe8   : > { %v575_v47 = vadd.f32 %v570_v50, %v563_v57 }
  0xe9   : > { %v584_v53 = vadd.f32 %v580_v24, %v576_v14 }
  0xeb   : > { %v592_v42 = vadd.f32 %v588_v16, %v584_v53 }
  0xee   : > { %v578_v51 = vpop.permute.xlu1 %577  ;;  %v596_v0 = vpop.permute.xlu2 %595 }
  0xef   : > { %v717_v49 = vpop.permute.xlu0 %716  ;;  %v583_v5 = vadd.f32 %v578_v51, %v575_v47 }
  0xf0   : > { %v721_v52 = vadd.f32 %v717_v49, %v709_v27 }
  0xf6   : > { %v725_v9 = vpop.permute.xlu1 %724  ;;  %v743_v17 = vpop.permute.xlu2 %742 }
  0xf7   : > { %v723_v58 = vpop.permute.xlu0 %722  ;;  %v729_v19 = vadd.f32 %v725_v9, %v721_v52 }
  0xf8   : > { %v728_v23 = vadd.f32 %v723_v58, %v720_v21 }
  0xfe   : > { %v586_v12 = vpop.permute.xlu1 %585  ;;  %v848_v29 = vpop.permute.xlu2 %847 }
  0xff   : > { %v453_v60 = vpop.permute.xlu0 %452  ;;  %v591_v61 = vadd.f32 %v586_v12, %v583_v5 }
 0x100   : > { %v457_v37 = vadd.f32 %v453_v60, %v447_v41  ;;  %v917_v41 = vadd.f32 0.0001, %v915_v63 }
 0x101   : > { %v601_v54 = vadd.f32 %v596_v0, %v591_v61 }
 0x102   : > { %v896_v55 = vmul.f32 %v457_v37, %v457_v37  ;;  %v1521_v62 = vmul.f32 %v457_v37, %v1498_v59 }
 0x103   : > { %v899_v56 = vsub.f32 %v601_v54, %v893_v32 }
 0x104   : > { %v916_v25 = vadd.f32 %v896_v55, %v894_v7  ;;  %v906_v14 = vmul.f32 2.0, %v1521_v62 }
 0x106   : > { %v733_v15 = vpop.permute.xlu1 %732  ;;  %v918_v48 = vadd.f32 0.0001, %v916_v25  ;;  %v862_v36 = vpop.permute.xlu2 %861 }
 0x107   : > { %v731_v11 = vpop.permute.xlu0 %730  ;;  %v737_v18 = vadd.f32 %v733_v15, %v729_v19 }
 0x108   : > { %v736_v59 = vadd.f32 %v731_v11, %v728_v23 }
 0x109   : > { %v747_v22 = vadd.f32 %v743_v17, %v737_v18 }
 0x10b   : > { %v902_v1 = vsub.f32 %v747_v22, %v896_v55 }
 0x10e   : > { %v741_v26 = vpop.permute.xlu1 %740  ;;  %v876_v63 = vpop.permute.xlu2 %875 }
 0x10f   : > { %v598_v46 = vpop.permute.xlu0 %597  ;;  %v746_v33 = vadd.f32 %v741_v26, %v736_v59 }
 0x110   : > { %v602_v28 = vadd.f32 %v598_v46, %v592_v42 }
 0x111   : > { %v901_v34 = vsub.f32 %v746_v33, %v895_v8 }
 0x112   : > { %v900_v30 = vsub.f32 %v602_v28, %v894_v7 }
 0x113   : > { %v919_v39 = vadd.f32 %v901_v34, %v899_v56 }
 0x114   : > { %v920_v40 = vadd.f32 %v902_v1, %v900_v30 }
 0x115   : > { %v921_v44 = vadd.f32 0.0009, %v919_v39 }
 0x116   : > { %v922_v13 = vadd.f32 0.0009, %v920_v40  ;;  %v838_v20 = vpop.permute.xlu1 %837  ;;  %v888_v43 = vpop.permute.xlu2 %887 }
 0x117   : > { %v923_v2 = vmul.f32 %v921_v44, %v917_v41  ;;  %v836_v24 = vpop.permute.xlu0 %835  ;;  %v842_v16 = vadd.f32 %v838_v20, %v1507_v35  ;;  %v905_v35 = vmul.f32 2.0, %v1516_v3 }
 0x118   : > { %v1524_v31 = vmul.f32 %v922_v13, %v918_v48  ;;  %v841_v8 = vadd.f32 %v836_v24, %v1505_v38 }
 0x119   : > { %1061 = vrcp.f32 %v923_v2  ;;  %v936_v19 = vand.u32 2147483648, %v923_v2  ;;  %vm930_vm7 = vweird.f32 %v923_v2  ;;  %v934_v17 = vand.u32 2147483647, %v923_v2 }
 0x11a   : > { %1063 = vrcp.f32 %v1524_v31  ;;  %v853_v51 = vadd.f32 %v848_v29, %v841_v8  ;;  %v907_v22 = vadd.f32 0.0001, %v905_v35  ;;  %v951_v23 = vand.u32 2147483648, %v1524_v31 }
 0x11b   : > { %v937_v59 = vor.u32 1.1754944e-38, %v936_v19  ;;  %vm945_vm10 = vweird.f32 %v1524_v31  ;;  %v949_v42 = vand.u32 2147483647, %v1524_v31  ;;  %vm935_vm11 = vcmp.eq.f32.partialorder %v934_v17, 8.507059e+37 }
 0x11c   : > { %v952_v29 = vor.u32 1.1754944e-38, %v951_v23 }
 0x11d   : > { %vm950_vm14 = vcmp.eq.f32.partialorder %v949_v42, 8.507059e+37 }
 0x11e   : > { %v860_v45 = vpop.permute.xlu1 %859 }
 0x11f   : > { %v850_v32 = vpop.permute.xlu0 %849  ;;  %v1062_v6 = vpop.eup %1061  ;;  %v865_v58 = vadd.f32 %v860_v45, %v853_v51 }
 0x120   : > { %v1064_v50 = vpop.eup %1063  ;;  %v926_v49 = vmul.f32 %v1062_v6, %v923_v2  ;;  %v854_v47 = vadd.f32 %v850_v32, %v842_v16  ;;  %vm931_vm6 = vweird.f32 %v1062_v6 }
 0x121   : > { %v941_v0 = vmul.f32 %v1064_v50, %v1524_v31  ;;  %vm1534_vm8 = vmor %vm930_vm7, %vm931_vm6  ;;  %vm946_vm9 = vweird.f32 %v1064_v50 }
 0x122   : > { %v927_v12 = vsub.f32 1.0, %v926_v49  ;;  %v866_v60 = vadd.f32 %v862_v36, %v854_v47  ;;  %vm947_vm12 = vmor %vm945_vm10, %vm946_vm9 }
 0x123   : > { %v942_v61 = vsub.f32 1.0, %v941_v0 }
 0x124   : > { %v928_v27 = vmul.f32 %v1062_v6, %v927_v12 }
 0x125   : > { %v943_v56 = vmul.f32 %v1064_v50, %v942_v61 }
 0x126   : > { %v870_v9 = vpop.permute.xlu1 %869  ;;  %v929_v25 = vadd.f32 %v1062_v6, %v928_v27 }
 0x127   : > { %v868_v57 = vpop.permute.xlu0 %867  ;;  %v874_v38 = vadd.f32 %v870_v9, %v866_v60  ;;  %v944_v21 = vadd.f32 %v1064_v50, %v943_v56 }
 0x128   : > { %v873_v5 = vadd.f32 %v868_v57, %v865_v58 }
 0x129   : > { %v948_v28 = vsel %vm947_vm12, %v1064_v50, %v944_v21 }
 0x12a   : > { %v881_v37 = vadd.f32 %v876_v63, %v873_v5  ;;  %v953_v40 = vsel %vm950_vm14, %v952_v29, %v948_v28 }
 0x12e   : > { %v886_v54 = vpop.permute.xlu1 %885 }
 0x12f   : > { %v878_v7 = vpop.permute.xlu0 %877  ;;  %v891_v55 = vadd.f32 %v886_v54, %v881_v37 }
 0x130   : > { %v882_v52 = vadd.f32 %v878_v7, %v874_v38 }
 0x131   : > { %v903_v4 = vsub.f32 %v891_v55, %v1516_v3  ;;  %v933_v3 = vsel %vm1534_vm8, %v1062_v6, %v929_v25 }
 0x132   : > { %v892_v10 = vadd.f32 %v888_v43, %v882_v52  ;;  %v938_v33 = vsel %vm935_vm11, %v937_v59, %v933_v3 }
 0x133   : > { %v909_v15 = vmul.f32 2.0, %v903_v4 }
 0x134   : > { %v904_v11 = vsub.f32 %v892_v10, %v1521_v62  ;;  %v908_v62 = vadd.f32 0.0001, %v906_v14 }
 0x135   : > { %v911_v53 = vadd.f32 0.0009, %v909_v15 }
 0x136   : > { %v910_v1 = vmul.f32 2.0, %v904_v11 }
 0x137   : > { %v913_v26 = vmul.f32 %v911_v53, %v907_v22 }
 0x138   : > { %v912_v46 = vadd.f32 0.0009, %v910_v1 }
 0x139   : > { %v939_v34 = vmul.f32 %v938_v33, %v913_v26 }
 0x13a   : > { %v914_v30 = vmul.f32 %v912_v46, %v908_v62 }
 0x13b   : > { %v956_v39 = vsel %vm955_vm13, %v939_v34, 0.0 }
 0x13c   : > { %957 = vadd.xlane.f32.xlu0 %v956_v39  ;;  %v954_v41 = vmul.f32 %v953_v40, %v914_v30 }
 0x13e   : > { %v959_v44 = vsel %vm955_vm13, %v954_v41, 0.0 }
 0x13f   : > { %960 = vadd.xlane.f32.xlu1 %v959_v44 }
 0x1af   : > { %v958_v48 = vpop.xlane.xlu0 %957 }
 0x1b2   : > { %v961_v13 = vpop.xlane.xlu1 %960 }
 0x1b3   : > { %v962_v20 = vadd.f32 %v961_v13, %v958_v48 }
 0x1b5   : > { %v963_v2 = vrot.slane %v962_v20, 4 }
 0x1b7   : > { %v964_v24 = vadd.f32 %v963_v2, %v962_v20 }
 0x1b9   : > { %v965_v31 = vrot.slane %v964_v24, 2 }
 0x1bb   : > { %v966_v36 = vadd.f32 %v965_v31, %v964_v24 }
 0x1bd   : > { %v967_v45 = vrot.slane %v966_v36, 1 }
 0x1bf   : > { %v968_v32 = vadd.f32 %v967_v45, %v966_v36 }
 0x1c1   : > { %970 = vst [vmem:[%s161_s27] sm:$0xff] %v968_v32 }
 0x1c2 PF: > { %s12_s9 = sadd.s32 1, %s1071_s9  }
 0x1c3   : > { %p9_p4 = scmp.ge.s32.totalorder %s12_s9, 4  }
 0x1c5   :  { %11 = sbr.rel (!%p9_p4) target bundleno = 1 (0x1), region = 61 }

</bundles_post_ra>
